<compile_context>
chip_gen: v7x
topology: tpu7x:2x2x1
jax: 0.10.0
libtpu: 0.0.40
codegen_flags: <defaults>
</compile_context>

<pallas_src>
import jax
import jax.numpy as jnp
from jax.experimental import pallas as pl
from jax.experimental.pallas import tpu as pltpu


_VMEM = pl.BlockSpec(memory_space=pltpu.MemorySpace.VMEM)
_SMEM = pl.BlockSpec(memory_space=pltpu.MemorySpace.SMEM)


# -----------------------------------------------------------------------------
# Fused kernel (conv_first=True):
#   out = relu( relu(conv1x1(x)) .flatten() @ W1 + b1 ) @ W2 + b2
# -----------------------------------------------------------------------------
def _qmlp_fused_kernel(x_ref, wc_ref, bc_ref, w1_ref, b1_ref, w2_ref, b2_ref,
                       o_ref):
    # x_ref : (B, C, HW)    f32  VMEM   (NCHW input with H*W merged)
    # wc_ref: (C, C)        f32  SMEM   (1x1 conv channel-mix weight)
    # bc_ref: (C,)          f32  SMEM
    # w1_ref: (C, HW, 512)  bf16 VMEM   (Linear(D,512) weight, split per channel)
    # b1_ref: (1, 512)      f32  VMEM
    # w2_ref: (512, Ap)     bf16 VMEM   (Linear(512,A) weight, A padded to 128)
    # b2_ref: (1, Ap)       f32  VMEM
    # o_ref : (B, Ap)       f32  VMEM
    B, C, HW = x_ref.shape
    Dh = w1_ref.shape[2]

    x = x_ref[...]                                    # (B, C, HW) f32
    xs = [x[:, c, :] for c in range(C)]               # C slabs of (B, HW)

    # Channel mix (the 1x1 conv) on the VPU, fused with ReLU and the matching
    # per-channel slab of the first Linear.  h accumulates in f32.
    h = jnp.zeros((B, Dh), jnp.float32)
    for o in range(C):                                # static, C=4 -> unrolled
        y = bc_ref[o] + wc_ref[o, 0] * xs[0]
        for c in range(1, C):
            y = y + wc_ref[o, c] * xs[c]
        y = jnp.maximum(y, 0.0).astype(jnp.bfloat16)  # ReLU, bf16 for the MXU
        h = h + jnp.dot(y, w1_ref[o], preferred_element_type=jnp.float32)

    h = jnp.maximum(h + b1_ref[...], 0.0).astype(jnp.bfloat16)
    o_ref[...] = (
        jnp.dot(h, w2_ref[...], preferred_element_type=jnp.float32) + b2_ref[...]
    )


def qmlp_fused_pallas(x_bchw, wc, bc, w1_bf16, b1, w2p_bf16, b2p):
    """x: (B,C,H,W) f32.  Returns (B, A_pad) f32 Q-values (lane-padded)."""
    B, C, H, W = x_bchw.shape
    HW = H * W
    Dh = w1_bf16.shape[1]
    Ap = w2p_bf16.shape[1]
    x3 = x_bchw.reshape(B, C, HW)                     # contiguous view
    w1r = w1_bf16.reshape(C, HW, Dh)                  # contiguous view
    return pl.pallas_call(
        _qmlp_fused_kernel,
        out_shape=jax.ShapeDtypeStruct((B, Ap), jnp.float32),
        in_specs=[_VMEM, _SMEM, _SMEM, _VMEM, _VMEM, _VMEM, _VMEM],
        out_specs=_VMEM,
    )(x3, wc, bc, w1r, b1.reshape(1, Dh), w2p_bf16, b2p.reshape(1, Ap))


# -----------------------------------------------------------------------------
# MLP-only kernel (conv_first=False): out = relu(z @ W1 + b1) @ W2 + b2
# -----------------------------------------------------------------------------
def _mlp_kernel(z_ref, w1_ref, b1_ref, w2_ref, b2_ref, o_ref):
    z = z_ref[...].astype(jnp.bfloat16)
    h = jnp.dot(z, w1_ref[...], preferred_element_type=jnp.float32)
    h = jnp.maximum(h + b1_ref[...], 0.0).astype(jnp.bfloat16)
    o_ref[...] = (
        jnp.dot(h, w2_ref[...], preferred_element_type=jnp.float32) + b2_ref[...]
    )


def mlp_pallas(z, w1_bf16, b1, w2p_bf16, b2p):
    B = z.shape[0]
    Dh = w1_bf16.shape[1]
    Ap = w2p_bf16.shape[1]
    return pl.pallas_call(
        _mlp_kernel,
        out_shape=jax.ShapeDtypeStruct((B, Ap), jnp.float32),
        in_specs=[_VMEM] * 5,
        out_specs=_VMEM,
    )(z, w1_bf16, b1.reshape(1, Dh), w2p_bf16, b2p.reshape(1, Ap))


# -----------------------------------------------------------------------------
# Q_MLP module
# -----------------------------------------------------------------------------
class QMLPPallas:
    """Pallas port of Q_MLP: Conv2d(C,C,1,1)+ReLU -> Flatten -> Linear(.,512)
    -> ReLU -> Linear(512, n_actions)."""

    def __init__(self, input_dim, n_actions, conv_first=True, key=None):
        C, H, W = input_dim
        self.input_dim = (C, H, W)
        self.conv_first = conv_first
        self.n_actions = n_actions
        if key is None:
            key = jax.random.PRNGKey(42)
        ks = jax.random.split(key, 6)
        sc = 0.05
        if conv_first:
            # torch Conv2d weight (Cout, Cin, 1, 1) stored as (Cout, Cin), f32.
            self.wc = sc * jax.random.normal(ks[0], (C, C), jnp.float32)
            self.bc = sc * jax.random.normal(ks[1], (C,), jnp.float32)
        D = C * H * W
        # Linear weights stored transposed for x @ W, streamed as bf16.
        self.w1 = (sc * jax.random.normal(ks[2], (D, 512), jnp.float32)
                   ).astype(jnp.bfloat16)
        self.b1 = sc * jax.random.normal(ks[3], (512,), jnp.float32)
        w2 = sc * jax.random.normal(ks[4], (512, n_actions), jnp.float32)
        b2 = sc * jax.random.normal(ks[5], (n_actions,), jnp.float32)
        # Zero-pad the action dim to a lane-dense multiple of 128.
        Ap = max(128, -(-n_actions // 128) * 128)
        self.a_pad = Ap
        self.w2_p = (jnp.zeros((512, Ap), jnp.float32)
                     .at[:, :n_actions].set(w2)).astype(jnp.bfloat16)
        self.b2_p = jnp.zeros((Ap,), jnp.float32).at[:n_actions].set(b2)

    def __call__(self, x):
        B = x.shape[0]
        if self.conv_first:
            out = qmlp_fused_pallas(x, self.wc, self.bc, self.w1, self.b1,
                                    self.w2_p, self.b2_p)
        else:
            z = x.reshape(B, -1)
            out = mlp_pallas(z, self.w1, self.b1, self.w2_p, self.b2_p)
        return out[:, :self.n_actions]


# -----------------------------------------------------------------------------
# Pure-JAX references for correctness checking
# -----------------------------------------------------------------------------
def reference_forward(model, x, mirror_bf16=True):
    hp = jax.lax.Precision.HIGHEST
    if model.conv_first:
        y = jnp.einsum("oc,bchw->bohw", model.wc, x, precision=hp)
        y = jnp.maximum(y + model.bc[None, :, None, None], 0.0)
    else:
        y = x
    z = y.reshape(x.shape[0], -1)
    w1 = model.w1.astype(jnp.float32)
    w2 = model.w2_p.astype(jnp.float32)[:, :model.n_actions]
    b2 = model.b2_p[:model.n_actions]
    if mirror_bf16:
        z = z.astype(jnp.bfloat16).astype(jnp.float32)
    h = jnp.maximum(jnp.dot(z, w1, precision=hp) + model.b1, 0.0)
    if mirror_bf16:
        h = h.astype(jnp.bfloat16).astype(jnp.float32)
    return jnp.dot(h, w2, precision=hp) + b2


if __name__ == "__main__":
    key = jax.random.PRNGKey(0)
    B, C, H, W = 2, 4, 16, 16        # input_dim = (4, 16, 16)
    n_actions = 6
    x = jax.random.normal(key, (B, C, H, W), jnp.float32)

    # --- conv_first=True (default Q_MLP configuration), fused kernel --------
    model = QMLPPallas((C, H, W), n_actions, conv_first=True)
    out = jax.block_until_ready(model(x))
    assert out.shape == (B, n_actions), out.shape
    assert bool(jnp.all(jnp.isfinite(out)))

    ref = reference_forward(model, x, mirror_bf16=True)
    err = float(jnp.max(jnp.abs(out - ref)))
    assert err < 5e-3, f"fused kernel vs bf16-mirrored reference: {err}"

    ref32 = reference_forward(model, x, mirror_bf16=False)
    err32 = float(jnp.max(jnp.abs(out - ref32)))
    assert err32 < 5e-2, f"fused kernel vs full-f32 reference: {err32}"

    # --- conv_first=False (flatten -> MLP only) ------------------------------
    model2 = QMLPPallas((C, H, W), n_actions, conv_first=False,
                        key=jax.random.PRNGKey(7))
    out2 = jax.block_until_ready(model2(x))
    assert out2.shape == (B, n_actions)
    ref2 = reference_forward(model2, x, mirror_bf16=True)
    err2 = float(jnp.max(jnp.abs(out2 - ref2)))
    assert err2 < 5e-3, f"mlp kernel vs bf16-mirrored reference: {err2}"

    print("KERNEL_OK")
</pallas_src>

<mosaic_0001>
module attributes {stable_mosaic.version = 11 : i64} {
  func.func @_qmlp_fused_kernel(%arg0: memref<2x4x256xf32, #tpu.memory_space<vmem>>, %arg1: memref<4x4xf32, #tpu.memory_space<smem>>, %arg2: memref<4xf32, #tpu.memory_space<smem>>, %arg3: memref<4x256x512xbf16, #tpu.memory_space<vmem>>, %arg4: memref<1x512xf32, #tpu.memory_space<vmem>>, %arg5: memref<512x128xbf16, #tpu.memory_space<vmem>>, %arg6: memref<1x128xf32, #tpu.memory_space<vmem>>, %arg7: memref<2x128xf32, #tpu.memory_space<vmem>>) attributes {dimension_semantics = [], scalar_prefetch = 0 : i64, scratch_operands = 0 : i64, tpu.core_type = #tpu.core_type<tc>} {
    %c0 = arith.constant 0 : index
    %c0_0 = arith.constant 0 : index
    %c0_1 = arith.constant 0 : index
    %0 = vector.load %arg0[%c0, %c0_0, %c0_1] : memref<2x4x256xf32, #tpu.memory_space<vmem>>, vector<2x4x256xf32>
    %1 = vector.extract_strided_slice %0 {offsets = [0, 0, 0], sizes = [2, 1, 256], strides = [1, 1, 1]} : vector<2x4x256xf32> to vector<2x1x256xf32>
    %2 = vector.shape_cast %1 : vector<2x1x256xf32> to vector<2x256xf32>
    %3 = vector.extract_strided_slice %0 {offsets = [0, 1, 0], sizes = [2, 1, 256], strides = [1, 1, 1]} : vector<2x4x256xf32> to vector<2x1x256xf32>
    %4 = vector.shape_cast %3 : vector<2x1x256xf32> to vector<2x256xf32>
    %5 = vector.extract_strided_slice %0 {offsets = [0, 2, 0], sizes = [2, 1, 256], strides = [1, 1, 1]} : vector<2x4x256xf32> to vector<2x1x256xf32>
    %6 = vector.shape_cast %5 : vector<2x1x256xf32> to vector<2x256xf32>
    %7 = vector.extract_strided_slice %0 {offsets = [0, 3, 0], sizes = [2, 1, 256], strides = [1, 1, 1]} : vector<2x4x256xf32> to vector<2x1x256xf32>
    %8 = vector.shape_cast %7 : vector<2x1x256xf32> to vector<2x256xf32>
    %cst = arith.constant 0.000000e+00 : f32
    %9 = vector.broadcast %cst : f32 to vector<2x512xf32>
    %c0_2 = arith.constant 0 : index
    %10 = memref.load %arg2[%c0_2] : memref<4xf32, #tpu.memory_space<smem>>
    %c0_3 = arith.constant 0 : index
    %c0_4 = arith.constant 0 : index
    %11 = memref.load %arg1[%c0_3, %c0_4] : memref<4x4xf32, #tpu.memory_space<smem>>
    %12 = vector.broadcast %11 : f32 to vector<2x256xf32>
    %13 = arith.mulf %12, %2 : vector<2x256xf32>
    %14 = vector.broadcast %10 : f32 to vector<2x256xf32>
    %15 = arith.addf %14, %13 : vector<2x256xf32>
    %c0_5 = arith.constant 0 : index
    %c1 = arith.constant 1 : index
    %16 = memref.load %arg1[%c0_5, %c1] : memref<4x4xf32, #tpu.memory_space<smem>>
    %17 = vector.broadcast %16 : f32 to vector<2x256xf32>
    %18 = arith.mulf %17, %4 : vector<2x256xf32>
    %19 = arith.addf %15, %18 : vector<2x256xf32>
    %c0_6 = arith.constant 0 : index
    %c2 = arith.constant 2 : index
    %20 = memref.load %arg1[%c0_6, %c2] : memref<4x4xf32, #tpu.memory_space<smem>>
    %21 = vector.broadcast %20 : f32 to vector<2x256xf32>
    %22 = arith.mulf %21, %6 : vector<2x256xf32>
    %23 = arith.addf %19, %22 : vector<2x256xf32>
    %c0_7 = arith.constant 0 : index
    %c3 = arith.constant 3 : index
    %24 = memref.load %arg1[%c0_7, %c3] : memref<4x4xf32, #tpu.memory_space<smem>>
    %25 = vector.broadcast %24 : f32 to vector<2x256xf32>
    %26 = arith.mulf %25, %8 : vector<2x256xf32>
    %27 = arith.addf %23, %26 : vector<2x256xf32>
    %cst_8 = arith.constant 0.000000e+00 : f32
    %28 = vector.broadcast %cst_8 : f32 to vector<2x256xf32>
    %29 = arith.maximumf %27, %28 : vector<2x256xf32>
    %30 = arith.truncf %29 : vector<2x256xf32> to vector<2x256xbf16>
    %c0_9 = arith.constant 0 : index
    %c0_10 = arith.constant 0 : index
    %c0_11 = arith.constant 0 : index
    %31 = vector.load %arg3[%c0_9, %c0_10, %c0_11] : memref<4x256x512xbf16, #tpu.memory_space<vmem>>, vector<1x256x512xbf16>
    %32 = vector.shape_cast %31 : vector<1x256x512xbf16> to vector<256x512xbf16>
    %cst_12 = arith.constant dense<0.000000e+00> : vector<2x512xf32>
    %33 = tpu.matmul %30, %32, %cst_12 {dimension_numbers = #tpu.dot_dimension_numbers<[1], [0], [0], [1], [0, 0, 1, 1], [], []>} : vector<2x256xbf16>, vector<256x512xbf16>, vector<2x512xf32> -> vector<2x512xf32>
    %34 = arith.addf %9, %33 : vector<2x512xf32>
    %c1_13 = arith.constant 1 : index
    %35 = memref.load %arg2[%c1_13] : memref<4xf32, #tpu.memory_space<smem>>
    %c1_14 = arith.constant 1 : index
    %c0_15 = arith.constant 0 : index
    %36 = memref.load %arg1[%c1_14, %c0_15] : memref<4x4xf32, #tpu.memory_space<smem>>
    %37 = vector.broadcast %36 : f32 to vector<2x256xf32>
    %38 = arith.mulf %37, %2 : vector<2x256xf32>
    %39 = vector.broadcast %35 : f32 to vector<2x256xf32>
    %40 = arith.addf %39, %38 : vector<2x256xf32>
    %c1_16 = arith.constant 1 : index
    %c1_17 = arith.constant 1 : index
    %41 = memref.load %arg1[%c1_16, %c1_17] : memref<4x4xf32, #tpu.memory_space<smem>>
    %42 = vector.broadcast %41 : f32 to vector<2x256xf32>
    %43 = arith.mulf %42, %4 : vector<2x256xf32>
    %44 = arith.addf %40, %43 : vector<2x256xf32>
    %c1_18 = arith.constant 1 : index
    %c2_19 = arith.constant 2 : index
    %45 = memref.load %arg1[%c1_18, %c2_19] : memref<4x4xf32, #tpu.memory_space<smem>>
    %46 = vector.broadcast %45 : f32 to vector<2x256xf32>
    %47 = arith.mulf %46, %6 : vector<2x256xf32>
    %48 = arith.addf %44, %47 : vector<2x256xf32>
    %c1_20 = arith.constant 1 : index
    %c3_21 = arith.constant 3 : index
    %49 = memref.load %arg1[%c1_20, %c3_21] : memref<4x4xf32, #tpu.memory_space<smem>>
    %50 = vector.broadcast %49 : f32 to vector<2x256xf32>
    %51 = arith.mulf %50, %8 : vector<2x256xf32>
    %52 = arith.addf %48, %51 : vector<2x256xf32>
    %cst_22 = arith.constant 0.000000e+00 : f32
    %53 = vector.broadcast %cst_22 : f32 to vector<2x256xf32>
    %54 = arith.maximumf %52, %53 : vector<2x256xf32>
    %55 = arith.truncf %54 : vector<2x256xf32> to vector<2x256xbf16>
    %c1_23 = arith.constant 1 : index
    %c0_24 = arith.constant 0 : index
    %c0_25 = arith.constant 0 : index
    %56 = vector.load %arg3[%c1_23, %c0_24, %c0_25] : memref<4x256x512xbf16, #tpu.memory_space<vmem>>, vector<1x256x512xbf16>
    %57 = vector.shape_cast %56 : vector<1x256x512xbf16> to vector<256x512xbf16>
    %cst_26 = arith.constant dense<0.000000e+00> : vector<2x512xf32>
    %58 = tpu.matmul %55, %57, %cst_26 {dimension_numbers = #tpu.dot_dimension_numbers<[1], [0], [0], [1], [0, 0, 1, 1], [], []>} : vector<2x256xbf16>, vector<256x512xbf16>, vector<2x512xf32> -> vector<2x512xf32>
    %59 = arith.addf %34, %58 : vector<2x512xf32>
    %c2_27 = arith.constant 2 : index
    %60 = memref.load %arg2[%c2_27] : memref<4xf32, #tpu.memory_space<smem>>
    %c2_28 = arith.constant 2 : index
    %c0_29 = arith.constant 0 : index
    %61 = memref.load %arg1[%c2_28, %c0_29] : memref<4x4xf32, #tpu.memory_space<smem>>
    %62 = vector.broadcast %61 : f32 to vector<2x256xf32>
    %63 = arith.mulf %62, %2 : vector<2x256xf32>
    %64 = vector.broadcast %60 : f32 to vector<2x256xf32>
    %65 = arith.addf %64, %63 : vector<2x256xf32>
    %c2_30 = arith.constant 2 : index
    %c1_31 = arith.constant 1 : index
    %66 = memref.load %arg1[%c2_30, %c1_31] : memref<4x4xf32, #tpu.memory_space<smem>>
    %67 = vector.broadcast %66 : f32 to vector<2x256xf32>
    %68 = arith.mulf %67, %4 : vector<2x256xf32>
    %69 = arith.addf %65, %68 : vector<2x256xf32>
    %c2_32 = arith.constant 2 : index
    %c2_33 = arith.constant 2 : index
    %70 = memref.load %arg1[%c2_32, %c2_33] : memref<4x4xf32, #tpu.memory_space<smem>>
    %71 = vector.broadcast %70 : f32 to vector<2x256xf32>
    %72 = arith.mulf %71, %6 : vector<2x256xf32>
    %73 = arith.addf %69, %72 : vector<2x256xf32>
    %c2_34 = arith.constant 2 : index
    %c3_35 = arith.constant 3 : index
    %74 = memref.load %arg1[%c2_34, %c3_35] : memref<4x4xf32, #tpu.memory_space<smem>>
    %75 = vector.broadcast %74 : f32 to vector<2x256xf32>
    %76 = arith.mulf %75, %8 : vector<2x256xf32>
    %77 = arith.addf %73, %76 : vector<2x256xf32>
    %cst_36 = arith.constant 0.000000e+00 : f32
    %78 = vector.broadcast %cst_36 : f32 to vector<2x256xf32>
    %79 = arith.maximumf %77, %78 : vector<2x256xf32>
    %80 = arith.truncf %79 : vector<2x256xf32> to vector<2x256xbf16>
    %c2_37 = arith.constant 2 : index
    %c0_38 = arith.constant 0 : index
    %c0_39 = arith.constant 0 : index
    %81 = vector.load %arg3[%c2_37, %c0_38, %c0_39] : memref<4x256x512xbf16, #tpu.memory_space<vmem>>, vector<1x256x512xbf16>
    %82 = vector.shape_cast %81 : vector<1x256x512xbf16> to vector<256x512xbf16>
    %cst_40 = arith.constant dense<0.000000e+00> : vector<2x512xf32>
    %83 = tpu.matmul %80, %82, %cst_40 {dimension_numbers = #tpu.dot_dimension_numbers<[1], [0], [0], [1], [0, 0, 1, 1], [], []>} : vector<2x256xbf16>, vector<256x512xbf16>, vector<2x512xf32> -> vector<2x512xf32>
    %84 = arith.addf %59, %83 : vector<2x512xf32>
    %c3_41 = arith.constant 3 : index
    %85 = memref.load %arg2[%c3_41] : memref<4xf32, #tpu.memory_space<smem>>
    %c3_42 = arith.constant 3 : index
    %c0_43 = arith.constant 0 : index
    %86 = memref.load %arg1[%c3_42, %c0_43] : memref<4x4xf32, #tpu.memory_space<smem>>
    %87 = vector.broadcast %86 : f32 to vector<2x256xf32>
    %88 = arith.mulf %87, %2 : vector<2x256xf32>
    %89 = vector.broadcast %85 : f32 to vector<2x256xf32>
    %90 = arith.addf %89, %88 : vector<2x256xf32>
    %c3_44 = arith.constant 3 : index
    %c1_45 = arith.constant 1 : index
    %91 = memref.load %arg1[%c3_44, %c1_45] : memref<4x4xf32, #tpu.memory_space<smem>>
    %92 = vector.broadcast %91 : f32 to vector<2x256xf32>
    %93 = arith.mulf %92, %4 : vector<2x256xf32>
    %94 = arith.addf %90, %93 : vector<2x256xf32>
    %c3_46 = arith.constant 3 : index
    %c2_47 = arith.constant 2 : index
    %95 = memref.load %arg1[%c3_46, %c2_47] : memref<4x4xf32, #tpu.memory_space<smem>>
    %96 = vector.broadcast %95 : f32 to vector<2x256xf32>
    %97 = arith.mulf %96, %6 : vector<2x256xf32>
    %98 = arith.addf %94, %97 : vector<2x256xf32>
    %c3_48 = arith.constant 3 : index
    %c3_49 = arith.constant 3 : index
    %99 = memref.load %arg1[%c3_48, %c3_49] : memref<4x4xf32, #tpu.memory_space<smem>>
    %100 = vector.broadcast %99 : f32 to vector<2x256xf32>
    %101 = arith.mulf %100, %8 : vector<2x256xf32>
    %102 = arith.addf %98, %101 : vector<2x256xf32>
    %cst_50 = arith.constant 0.000000e+00 : f32
    %103 = vector.broadcast %cst_50 : f32 to vector<2x256xf32>
    %104 = arith.maximumf %102, %103 : vector<2x256xf32>
    %105 = arith.truncf %104 : vector<2x256xf32> to vector<2x256xbf16>
    %c3_51 = arith.constant 3 : index
    %c0_52 = arith.constant 0 : index
    %c0_53 = arith.constant 0 : index
    %106 = vector.load %arg3[%c3_51, %c0_52, %c0_53] : memref<4x256x512xbf16, #tpu.memory_space<vmem>>, vector<1x256x512xbf16>
    %107 = vector.shape_cast %106 : vector<1x256x512xbf16> to vector<256x512xbf16>
    %cst_54 = arith.constant dense<0.000000e+00> : vector<2x512xf32>
    %108 = tpu.matmul %105, %107, %cst_54 {dimension_numbers = #tpu.dot_dimension_numbers<[1], [0], [0], [1], [0, 0, 1, 1], [], []>} : vector<2x256xbf16>, vector<256x512xbf16>, vector<2x512xf32> -> vector<2x512xf32>
    %109 = arith.addf %84, %108 : vector<2x512xf32>
    %c0_55 = arith.constant 0 : index
    %c0_56 = arith.constant 0 : index
    %110 = vector.load %arg4[%c0_55, %c0_56] : memref<1x512xf32, #tpu.memory_space<vmem>>, vector<1x512xf32>
    %111 = vector.broadcast %110 : vector<1x512xf32> to vector<2x512xf32>
    %112 = arith.addf %109, %111 : vector<2x512xf32>
    %cst_57 = arith.constant 0.000000e+00 : f32
    %113 = vector.broadcast %cst_57 : f32 to vector<2x512xf32>
    %114 = arith.maximumf %112, %113 : vector<2x512xf32>
    %115 = arith.truncf %114 : vector<2x512xf32> to vector<2x512xbf16>
    %c0_58 = arith.constant 0 : index
    %c0_59 = arith.constant 0 : index
    %116 = vector.load %arg5[%c0_58, %c0_59] : memref<512x128xbf16, #tpu.memory_space<vmem>>, vector<512x128xbf16>
    %cst_60 = arith.constant dense<0.000000e+00> : vector<2x128xf32>
    %117 = tpu.matmul %115, %116, %cst_60 {dimension_numbers = #tpu.dot_dimension_numbers<[1], [0], [0], [1], [0, 0, 1, 1], [], []>} : vector<2x512xbf16>, vector<512x128xbf16>, vector<2x128xf32> -> vector<2x128xf32>
    %c0_61 = arith.constant 0 : index
    %c0_62 = arith.constant 0 : index
    %118 = vector.load %arg6[%c0_61, %c0_62] : memref<1x128xf32, #tpu.memory_space<vmem>>, vector<1x128xf32>
    %119 = vector.broadcast %118 : vector<1x128xf32> to vector<2x128xf32>
    %120 = arith.addf %117, %119 : vector<2x128xf32>
    %c0_63 = arith.constant 0 : index
    %c0_64 = arith.constant 0 : index
    %121 = vector.load %arg7[%c0_63, %c0_64] : memref<2x128xf32, #tpu.memory_space<vmem>>, vector<2x128xf32>
    tpu.vector_store %arg7[%c0_63, %c0_64], %120 {strides = array<i32>} : memref<2x128xf32, #tpu.memory_space<vmem>>, vector<2x128xf32>,
    return
  }
}

</mosaic_0001>

<bundles_post_ra>
// kernel: tpu_custom_call.1
= control target key start
LH: loop header
LB: loop body
LE: loop exit
PB: predicated region body
PF: predicated region fallthrough
CT: control target
= control target key end

     0   :  { %12 = vsyncpa [#allocation3], 0  ;;  %s3957_s0 = inlined_call_operand.hbm [shape: f32[2,4,256], index: 0, kind: input, shape index: {}]   ;;  %s3958_s1 = inlined_call_operand.hbm [shape: f32[4,4], index: 1, kind: input, shape index: {}]   ;;  %s3959_s2 = inlined_call_operand.vmem [shape: f32[4], index: 2, kind: input, shape index: {}]   ;;  %s3960_s3 = inlined_call_operand.hbm [shape: bf16[4,256,512], index: 3, kind: input, shape index: {}]   ;;  %s3961_s4 = inlined_call_operand.vmem [shape: f32[1,512], index: 4, kind: input, shape index: {}]   ;;  %s3962_s5 = inlined_call_operand.hbm [shape: bf16[512,128], index: 5, kind: input, shape index: {}]   ;;  %s3963_s6 = inlined_call_operand.vmem [shape: f32[1,128], index: 6, kind: input, shape index: {}]   ;;  %s3964_s7 = inlined_call_operand.hbm [shape: f32[2,128], index: 7, kind: output, shape index: {}]  }
   0x1   :  { %13 = vsyncpa [#allocation5], 0 }
   0x2   :  { %14 = vsyncpa [#allocation6], 0 }
   0x3   :  { %15 = vsyncpa [#allocation10], 0 }
   0x4   :  { %16 = vsyncpa [#allocation4], 0  ;;  %s3666_s24 = smov [#allocation9]   ;;  %s3546_s28 = scalar_lea.hbm %s3960_s3, 32768 }
   0x5   :  { %s52_s25 = sshll.u32 %s3666_s24, 4  ;;  %p3547_p0 = scmp.ne.s32.totalorder %s3960_s3, %s3546_s28  ;;  %s53_s25 = int_to_ptr.vmem [resolvable:$true] %s52_s25 }
   0x6   :  { %p3550_p1 = scmp.lt.u32.totalorder %s3546_s28, %s3960_s3 }
   0x8   :  { %p3552_p2 = pnand %p3550_p1, %p3547_p0 }
   0xa   :  { %3555 = shalt.err (!%p3552_p2)
}
   0xb   :  { %s3556_s10 = scalar_lea.vmem %s53_s25, 32768  ;;  %p3561_p4 = scmp.lt.s32.totalorder %s53_s25, %s53_s25 }
   0xc   :  { %p3557_p3 = scmp.ne.s32.totalorder %s53_s25, %s3556_s10  ;;  %p3562_p5 = scmp.lt.s32.totalorder %s3556_s10, %s3556_s10 }
   0xe   :  { %p3563_p6 = por %p3562_p5, %p3561_p4 }
  0x10   :  { %p3564_p7 = pnand %p3563_p6, %p3557_p3 }
  0x12   :  { %3567 = shalt.err (!%p3564_p7)
}
  0x13   :  { %s3667_s11 = smov 256   ;;  %s3668_s12 = smov 16  }
  0x14   :  { %58 = dma.hbm_to_vmem [thread:$0]  %s3960_s3, 32768, %s53_s25, [#allocation10], %s3667_s11, %s3667_s11, %s3668_s12  }
  0x15   :  { %s3669_s15 = smov [#allocation2]   ;;  %s3568_s19 = scalar_lea.hbm %s3957_s0, 256 }
  0x16   :  { %s22_s16 = sshll.u32 %s3669_s15, 4  ;;  %p3569_p8 = scmp.ne.s32.totalorder %s3957_s0, %s3568_s19  ;;  %s23_s16 = int_to_ptr.vmem [resolvable:$true] %s22_s16 }
  0x17   :  { %p3572_p9 = scmp.lt.u32.totalorder %s3568_s19, %s3957_s0 }
  0x19   :  { %p3574_p10 = pnand %p3572_p9, %p3569_p8 }
  0x1b   :  { %3577 = shalt.err (!%p3574_p10)
}
  0x1c   :  { %s3578_s24 = scalar_lea.vmem %s23_s16, 256  ;;  %p3583_p12 = scmp.lt.s32.totalorder %s23_s16, %s23_s16 }
  0x1d   :  { %p3579_p11 = scmp.ne.s32.totalorder %s23_s16, %s3578_s24  ;;  %p3584_p13 = scmp.lt.s32.totalorder %s3578_s24, %s3578_s24 }
  0x1f   :  { %p3585_p0 = por %p3584_p13, %p3583_p12 }
  0x21   :  { %p3586_p1 = pnand %p3585_p0, %p3579_p11 }
  0x23   :  { %3589 = shalt.err (!%p3586_p1)
}
  0x24   :  { %s3670_s3 = smov 128   ;;  %s3671_s25 = smov 8  }
  0x25   :  { %28 = dma.hbm_to_vmem [thread:$0]  %s3957_s0, 256, %s23_s16, [#allocation3], %s3670_s3, %s3670_s3, %s3671_s25  }
  0x26   :  { %s43_s30 = sshll.u32 %s3959_s2, 4  ;;  %s3590_s10 = scalar_lea.hbm %s3958_s1, 64  ;;  %s44_s30 = int_to_ptr.vmem [resolvable:$true] %s43_s30 }
  0x27   :  { %p3591_p2 = scmp.ne.s32.totalorder %s3958_s1, %s3590_s10  ;;  %p3594_p3 = scmp.lt.u32.totalorder %s3590_s10, %s3958_s1 }
  0x29   :  { %p3596_p4 = pnand %p3594_p3, %p3591_p2 }
  0x2b   :  { %3599 = shalt.err (!%p3596_p4)
}
  0x2c   :  { %s3672_s15 = smov [#allocation7]   ;;  %s3600_s2 = scalar_lea.vmem %s44_s30, 16 }
  0x2d   :  { %36 = dma.hbm_to_smem %s3958_s1, 64, %s3672_s15, [#allocation5]  }
  0x2e   :  { %p3601_p5 = scmp.ne.s32.totalorder %s44_s30, %s3600_s2  ;;  %p3605_p6 = scmp.lt.s32.totalorder %s44_s30, %s44_s30 }
  0x2f   :  { %p3606_p7 = scmp.lt.s32.totalorder %s3600_s2, %s3600_s2 }
  0x31   :  { %p3607_p8 = por %p3606_p7, %p3605_p6 }
  0x33   :  { %p3608_p9 = pnand %p3607_p8, %p3601_p5 }
  0x35   :  { %3611 = shalt.err (!%p3608_p9)
}
  0x36   :  { %s3673_s17 = smov [#allocation8]   ;;  %s3674_s18 = smov [#allocation11]  }
  0x37   :  { %46 = dma.vmem_to_smem %s44_s30, 16, %s3673_s17, [#allocation6]  }
  0x38   :  { %s66_s19 = sshll.u32 %s3674_s18, 4  ;;  %s3612_s22 = scalar_lea.hbm %s3962_s5, 4096  ;;  %s67_s19 = int_to_ptr.vmem [resolvable:$true] %s66_s19 }
  0x39   :  { %p3613_p10 = scmp.ne.s32.totalorder %s3962_s5, %s3612_s22  ;;  %p3616_p11 = scmp.lt.u32.totalorder %s3612_s22, %s3962_s5 }
  0x3b   :  { %p3618_p12 = pnand %p3616_p11, %p3613_p10 }
  0x3d   :  { %3621 = shalt.err (!%p3618_p12)
}
  0x3e   :  { %s3622_s25 = scalar_lea.vmem %s67_s19, 4096  ;;  %p3627_p0 = scmp.lt.s32.totalorder %s67_s19, %s67_s19 }
  0x3f   :  { %p3623_p13 = scmp.ne.s32.totalorder %s67_s19, %s3622_s25  ;;  %p3628_p1 = scmp.lt.s32.totalorder %s3622_s25, %s3622_s25 }
  0x41   :  { %p3629_p2 = por %p3628_p1, %p3627_p0 }
  0x43   :  { %p3630_p3 = pnand %p3629_p2, %p3623_p13 }
  0x45   :  { %3633 = shalt.err (!%p3630_p3)
}
  0x46   :  { %s3675_s26 = smov 64   ;;  %s3676_s27 = smov 4  }
  0x47   :  { %72 = dma.hbm_to_vmem [thread:$0]  %s3962_s5, 4096, %s67_s19, [#allocation10], %s3675_s26, %s3675_s26, %s3676_s27  }
  0x48   :  { %3656 = dma.done.wait [#allocation3], 256  }
  0x49   :  { %3657 = vsyncadd [#allocation3], 4294967040 }
  0x4a   :  { %3658 = dma.done.wait [#allocation5], 64  }
  0x4b   :  { %3659 = vsyncadd [#allocation5], 4294967232 }
  0x4c   :  { %3660 = dma.done.wait [#allocation6], 16  }
  0x4d   :  { %3661 = vsyncadd [#allocation6], 4294967280 }
  0x4e   :  { %3662 = dma.done.wait [#allocation10], 36864  }
  0x4f   :  { %3663 = vsyncadd [#allocation10], 4294930432 }
  0x50   :  { %90 = sfence }
  0x51   :  { %v3129_v0 = vld [vmem:[#allocation9 + $0x204] ss:$16 sps:$4 sm:$0xff]   ;;  %v3131_v1 = vld [vmem:[#allocation9 + $0x20c] ss:$16 sps:$4 sm:$0xff]   ;;  %v3133_v2 = vld [vmem:[#allocation9 + $0x200] ss:$16 sps:$4 sm:$0xff]   ;;  %v148_v37 = vlaneseq }
  0x52   :  { %716 = vmatprep.subr.bf16.mxu0 %v3129_v0  ;;  %v3134_v3 = vld [vmem:[#allocation9 + $0x208] ss:$16 sps:$4 sm:$0xff]   ;;  %757 = vmatprep.subr.bf16.mxu1 %v3131_v1  ;;  %v3135_v4 = vld [vmem:[#allocation9 + $0x224] ss:$16 sps:$4 sm:$0xff]   ;;  %v3137_v5 = vld [vmem:[#allocation9 + $0x22c] ss:$16 sps:$4 sm:$0xff]  }
  0x53   :  { %717 = vmatpush1.bf16.msra.mxu0 %v3133_v2  ;;  %758 = vmatpush1.bf16.msra.mxu1 %v3134_v3  ;;  %v3139_v6 = vld [vmem:[#allocation9 + $0x220] ss:$16 sps:$4 sm:$0xff]   ;;  %v3140_v7 = vld [vmem:[#allocation9 + $0x228] ss:$16 sps:$4 sm:$0xff]   ;;  %v3141_v8 = vld [vmem:[#allocation9 + $0x244] ss:$16 sps:$4 sm:$0xff]  }
  0x54   :  { %718 = vmatprep.subr.bf16.mxu0 %v3135_v4  ;;  %759 = vmatprep.subr.bf16.mxu1 %v3137_v5  ;;  %v3143_v9 = vld [vmem:[#allocation9 + $0x24c] ss:$16 sps:$4 sm:$0xff]   ;;  %v3145_v10 = vld [vmem:[#allocation9 + $0x240] ss:$16 sps:$4 sm:$0xff]   ;;  %v3146_v11 = vld [vmem:[#allocation9 + $0x248] ss:$16 sps:$4 sm:$0xff]  }
  0x55   :  { %v3147_v12 = vld [vmem:[#allocation9 + $0x264] ss:$16 sps:$4 sm:$0xff]   ;;  %v3149_v13 = vld [vmem:[#allocation9 + $0x26c] ss:$16 sps:$4 sm:$0xff]   ;;  %v3151_v14 = vld [vmem:[#allocation9 + $0x260] ss:$16 sps:$4 sm:$0xff]  }
  0x56   :  { %v3152_v15 = vld [vmem:[#allocation9 + $0x268] ss:$16 sps:$4 sm:$0xff]   ;;  %v3153_v16 = vld [vmem:[#allocation9 + $0x284] ss:$16 sps:$4 sm:$0xff]   ;;  %v3155_v17 = vld [vmem:[#allocation9 + $0x28c] ss:$16 sps:$4 sm:$0xff]  }
  0x57   :  { %719 = vmatpush1.bf16.msra.mxu0 %v3139_v6  ;;  %760 = vmatpush1.bf16.msra.mxu1 %v3140_v7  ;;  %v3157_v18 = vld [vmem:[#allocation9 + $0x280] ss:$16 sps:$4 sm:$0xff]   ;;  %v3158_v19 = vld [vmem:[#allocation9 + $0x288] ss:$16 sps:$4 sm:$0xff]   ;;  %v3159_v20 = vld [vmem:[#allocation9 + $0x2a4] ss:$16 sps:$4 sm:$0xff]  }
  0x58   :  { %720 = vmatprep.subr.bf16.mxu0 %v3141_v8  ;;  %761 = vmatprep.subr.bf16.mxu1 %v3143_v9  ;;  %v3161_v21 = vld [vmem:[#allocation9 + $0x2ac] ss:$16 sps:$4 sm:$0xff]   ;;  %v3163_v22 = vld [vmem:[#allocation9 + $0x2a0] ss:$16 sps:$4 sm:$0xff]   ;;  %v3164_v23 = vld [vmem:[#allocation9 + $0x2a8] ss:$16 sps:$4 sm:$0xff]  }
  0x59   :  { %v3165_v24 = vld [vmem:[#allocation9 + $0x2c4] ss:$16 sps:$4 sm:$0xff]   ;;  %v3167_v25 = vld [vmem:[#allocation9 + $0x2cc] ss:$16 sps:$4 sm:$0xff]   ;;  %v3169_v26 = vld [vmem:[#allocation9 + $0x2c0] ss:$16 sps:$4 sm:$0xff]  }
  0x5a   :  { %v3170_v27 = vld [vmem:[#allocation9 + $0x2c8] ss:$16 sps:$4 sm:$0xff]   ;;  %v3171_v28 = vld [vmem:[#allocation9 + $0x2e4] ss:$16 sps:$4 sm:$0xff]   ;;  %v3173_v29 = vld [vmem:[#allocation9 + $0x2ec] ss:$16 sps:$4 sm:$0xff]  }
  0x5b   :  { %721 = vmatpush1.bf16.msra.mxu0 %v3145_v10  ;;  %762 = vmatpush1.bf16.msra.mxu1 %v3146_v11  ;;  %v3175_v30 = vld [vmem:[#allocation9 + $0x2e0] ss:$16 sps:$4 sm:$0xff]   ;;  %v3176_v31 = vld [vmem:[#allocation9 + $0x2e8] ss:$16 sps:$4 sm:$0xff]   ;;  %v3177_v32 = vld [vmem:[#allocation9 + $0x304] ss:$16 sps:$4 sm:$0xff]  }
  0x5c   :  { %722 = vmatprep.subr.bf16.mxu0 %v3147_v12  ;;  %763 = vmatprep.subr.bf16.mxu1 %v3149_v13  ;;  %v3179_v33 = vld [vmem:[#allocation9 + $0x30c] ss:$16 sps:$4 sm:$0xff]   ;;  %s3769_s5 = sld [smem:[#allocation8 + $0x1]]  ;;  %s3771_s30 = sld [smem:[#allocation7 + $0x80]]  ;;  %v3181_v34 = vld [vmem:[#allocation9 + $0x300] ss:$16 sps:$4 sm:$0xff]  }
  0x5d   :  { %s3773_s8 = sld [smem:[#allocation7 + $0x81]]  ;;  %v3182_v35 = vld [vmem:[#allocation9 + $0x308] ss:$16 sps:$4 sm:$0xff]   ;;  %s3775_s9 = sld [smem:[#allocation7 + $0x82]]  ;;  %v3183_v36 = vld [vmem:[#allocation9 + $0x324] ss:$16 sps:$4 sm:$0xff]  }
  0x5e   :  { %s3777_s10 = sld [smem:[#allocation7 + $0x83]]  ;;  %v3185_v38 = vld [vmem:[#allocation9 + $0x32c] ss:$16 sps:$4 sm:$0xff]   ;;  %s3779_s11 = sld [smem:[#allocation8]]  ;;  %v3187_v39 = vld [vmem:[#allocation9 + $0x320] ss:$16 sps:$4 sm:$0xff]  }
  0x5f   :  { %723 = vmatpush1.bf16.msra.mxu0 %v3151_v14  ;;  %764 = vmatpush1.bf16.msra.mxu1 %v3152_v15  ;;  %s3781_s12 = sld [smem:[#allocation7]]  ;;  %s3783_s13 = sld [smem:[#allocation7 + $0x1]]  ;;  %v3188_v40 = vld [vmem:[#allocation9 + $0x328] ss:$16 sps:$4 sm:$0xff]   ;;  %v3189_v41 = vld [vmem:[#allocation9 + $0x344] ss:$16 sps:$4 sm:$0xff]  }
  0x60   :  { %724 = vmatprep.subr.bf16.mxu0 %v3153_v16  ;;  %765 = vmatprep.subr.bf16.mxu1 %v3155_v17  ;;  %s3785_s14 = sld [smem:[#allocation7 + $0x2]]  ;;  %v3787_v42 = vshrl.u32 %v148_v37, 7  ;;  %v3191_v43 = vld [vmem:[#allocation9 + $0x34c] ss:$16 sps:$4 sm:$0xff]   ;;  %s3789_s15 = sld [smem:[#allocation7 + $0x3]]  ;;  %v3798_v54 = vld [vmem:[#allocation2] sm:$0xff] }
  0x61   :  { %v3193_v44 = vld [vmem:[#allocation9 + $0x340] ss:$16 sps:$4 sm:$0xff]   ;;  %v3194_v45 = vld [vmem:[#allocation9 + $0x348] ss:$16 sps:$4 sm:$0xff]   ;;  %v3195_v46 = vld [vmem:[#allocation9 + $0x364] ss:$16 sps:$4 sm:$0xff]  }
  0x62   :  { %v3792_v47 = vsub.s32 4, %v3787_v42  ;;  %v3197_v48 = vld [vmem:[#allocation9 + $0x36c] ss:$16 sps:$4 sm:$0xff]   ;;  %v238_v49 = vstv %s3771_s30  ;;  %v241_v50 = vstv %s3769_s5  ;;  %v3199_v53 = vld [vmem:[#allocation9 + $0x360] ss:$16 sps:$4 sm:$0xff]   ;;  %vm388_vm0 = vcmask 1041409  }
  0x63   :  { %725 = vmatpush1.bf16.msra.mxu0 %v3157_v18  ;;  %766 = vmatpush1.bf16.msra.mxu1 %v3158_v19  ;;  %v245_v51 = vstv %s3773_s8  ;;  %v259_v52 = vstv %s3775_s9  ;;  %v3804_v59 = vld [vmem:[#allocation2 + $0x8] sm:$0xff]  ;;  %v239_v60 = vmul.f32 %v238_v49, %v3798_v54  ;;  %v3201_v1 = vld [vmem:[#allocation9 + $0x384] ss:$16 sps:$4 sm:$0xff]   ;;  %v3205_v15 = vld [vmem:[#allocation9 + $0x380] ss:$16 sps:$4 sm:$0xff]   ;;  %s3846_s0 = sld [smem:[#allocation7 + $0x100]] }
  0x64   :  { %726 = vmatprep.subr.bf16.mxu0 %v3159_v20  ;;  %767 = vmatprep.subr.bf16.mxu1 %v3161_v21  ;;  %v273_v55 = vstv %s3777_s10  ;;  %v99_v57 = vstv %s3779_s11  ;;  %v246_v61 = vmul.f32 %v245_v51, %v3798_v54  ;;  %v260_v62 = vmul.f32 %v259_v52, %v3798_v54  ;;  %v3200_v0 = vld [vmem:[#allocation9 + $0x368] ss:$16 sps:$4 sm:$0xff]   ;;  %v3203_v6 = vld [vmem:[#allocation9 + $0x38c] ss:$16 sps:$4 sm:$0xff]   ;;  %v3207_v21 = vld [vmem:[#allocation9 + $0x3a4] ss:$16 sps:$4 sm:$0xff]  }
  0x65   :  { %v96_v56 = vstv %s3781_s12  ;;  %v103_v58 = vstv %s3783_s13  ;;  %v274_v63 = vmul.f32 %v273_v55, %v3798_v54  ;;  %v240_v2 = vmul.f32 %v238_v49, %v3804_v59  ;;  %v3206_v20 = vld [vmem:[#allocation9 + $0x388] ss:$16 sps:$4 sm:$0xff]   ;;  %s3848_s16 = sld [smem:[#allocation7 + $0x101]]  ;;  %s3850_s2 = sld [smem:[#allocation8 + $0x2]] }
  0x66   :  { %v247_v3 = vmul.f32 %v245_v51, %v3804_v59  ;;  %v261_v4 = vmul.f32 %v259_v52, %v3804_v59  ;;  %v117_v5 = vstv %s3785_s14  ;;  %v242_v7 = vadd.f32 %v241_v50, %v239_v60  ;;  %s3852_s17 = sld [smem:[#allocation7 + $0x102]]  ;;  %s3856_s18 = sld [smem:[#allocation7 + $0x103]] }
  0x67   :  { %727 = vmatpush1.bf16.msra.mxu0 %v3163_v22  ;;  %768 = vmatpush1.bf16.msra.mxu1 %v3164_v23  ;;  %v2754_v8 = vrot.slane %v246_v61, 9  ;;  %v2757_v9 = vrot.slane %v260_v62, 10  ;;  %v275_v10 = vmul.f32 %v273_v55, %v3804_v59  ;;  %v243_v11 = vadd.f32 %v241_v50, %v240_v2  ;;  %v3217_v55 = vld [vmem:[#allocation9 + $0x3c0] ss:$16 sps:$4 sm:$0xff]   ;;  %v3218_v61 = vld [vmem:[#allocation9 + $0x3c8] ss:$16 sps:$4 sm:$0xff]  }
  0x68   :  { %728 = vmatprep.subr.bf16.mxu0 %v3165_v24  ;;  %769 = vmatprep.subr.bf16.mxu1 %v3167_v25  ;;  %v2755_v12 = vrot.slane %v247_v3, 9  ;;  %v2758_v13 = vrot.slane %v261_v4, 10  ;;  %v131_v14 = vstv %s3789_s15  ;;  %v2760_v17 = vrot.slane %v274_v63, 11  ;;  %v3219_v62 = vld [vmem:[#allocation9 + $0x3e4] ss:$16 sps:$4 sm:$0xff]   ;;  %s3887_s19 = sld [smem:[#allocation7 + $0x180]] }
  0x69   :  { %v256_v16 = vadd.f32 %v2754_v8, %v242_v7  ;;  %v97_v18 = vmul.f32 %v96_v56, %v3798_v54  ;;  %v98_v19 = vmul.f32 %v96_v56, %v3804_v59  ;;  %v2761_v23 = vrot.slane %v275_v10, 11  ;;  %v3221_v2 = vld [vmem:[#allocation9 + $0x3ec] ss:$16 sps:$4 sm:$0xff]   ;;  %s3889_s20 = sld [smem:[#allocation7 + $0x181]]  ;;  %s3893_s21 = sld [smem:[#allocation8 + $0x3]] }
  0x6a   :  { %v257_v22 = vadd.f32 %v2755_v12, %v243_v11  ;;  %v104_v24 = vmul.f32 %v103_v58, %v3798_v54  ;;  %v105_v25 = vmul.f32 %v103_v58, %v3804_v59  ;;  %v119_v37 = vmul.f32 %v117_v5, %v3804_v59  ;;  %v3224_v12 = vld [vmem:[#allocation9 + $0x3e8] ss:$16 sps:$4 sm:$0xff]   ;;  %s3895_s22 = sld [smem:[#allocation7 + $0x182]]  ;;  %s3899_s23 = sld [smem:[#allocation7 + $0x183]] }
  0x6b   :  { %729 = vmatpush1.bf16.msra.mxu0 %v3169_v26  ;;  %770 = vmatpush1.bf16.msra.mxu1 %v3170_v27  ;;  %v3209_v26 = vld [vmem:[#allocation9 + $0x3ac] ss:$16 sps:$4 sm:$0xff]   ;;  %v270_v27 = vadd.f32 %v2757_v9, %v256_v16  ;;  %v3223_v9 = vld [vmem:[#allocation9 + $0x3e0] ss:$16 sps:$4 sm:$0xff]   ;;  %v3227_v16 = vld [vmem:[#allocation9 + $0x4] ss:$16 sps:$4 sm:$0xff]  }
  0x6c   :  { %730 = vmatprep.subr.bf16.mxu0 %v3171_v28  ;;  %771 = vmatprep.subr.bf16.mxu1 %v3173_v29  ;;  %v3821_v28 = vsub.s32 0, %v3787_v42  ;;  %v100_v29 = vadd.f32 %v99_v57, %v97_v18  ;;  %v2747_v50 = vrot.slane %v119_v37, 10  ;;  %v3230_v18 = vld [vmem:[#allocation9 + $0xc] ss:$16 sps:$4 sm:$0xff]   ;;  %v3234_v37 = vld [vmem:[#allocation9 + $0x28] ss:$16 sps:$4 sm:$0xff]  }
  0x6d   :  { %s3677_s25 = smov [#allocation12]  }
  0x6e   :  { %s2730_s26 = sshll.u32 %s3677_s25, 4  ;;  %s2731_s26 = int_to_ptr.vmem [resolvable:$true] %s2730_s26 }
  0x6f   :  { %731 = vmatpush1.bf16.msra.mxu0 %v3175_v30  ;;  %772 = vmatpush1.bf16.msra.mxu1 %v3176_v31  ;;  %v101_v30 = vadd.f32 %v99_v57, %v98_v19  ;;  %v271_v31 = vadd.f32 %v2758_v13, %v257_v22  ;;  %s3634_s27 = scalar_lea.vmem %s2731_s26, 32  ;;  %p3639_p5 = scmp.lt.s32.totalorder %s2731_s26, %s2731_s26 }
  0x70   :  { %732 = vmatprep.subr.bf16.mxu0 %v3177_v32  ;;  %773 = vmatprep.subr.bf16.mxu1 %v3179_v33  ;;  %v2743_v32 = vrot.slane %v104_v24, 9  ;;  %v2744_v33 = vrot.slane %v105_v25, 9  ;;  %p3635_p4 = scmp.ne.s32.totalorder %s2731_s26, %s3634_s27  ;;  %p3640_p6 = scmp.lt.s32.totalorder %s3634_s27, %s3634_s27 }
  0x72   :  { %p3641_p7 = por %p3640_p6, %p3639_p5 }
  0x73   :  { %733 = vmatpush1.bf16.msra.mxu0 %v3181_v34  ;;  %774 = vmatpush1.bf16.msra.mxu1 %v3182_v35  ;;  %v118_v34 = vmul.f32 %v117_v5, %v3798_v54  ;;  %v3211_v35 = vld [vmem:[#allocation9 + $0x3a0] ss:$16 sps:$4 sm:$0xff]  }
  0x74   :  { %734 = vmatprep.subr.bf16.mxu0 %v3183_v36  ;;  %775 = vmatprep.subr.bf16.mxu1 %v3185_v38  ;;  %v284_v36 = vadd.f32 %v2760_v17, %v270_v27  ;;  %v132_v38 = vmul.f32 %v131_v14, %v3798_v54  ;;  %v3228_v27 = vld [vmem:[#allocation9 + $0x8] ss:$16 sps:$4 sm:$0xff]   ;;  %p3642_p8 = pnand %p3641_p7, %p3635_p4 }
  0x76   :  { %v286_v49 = vmax.f32 %v284_v36, 0.0  ;;  %v3231_v36 = vld [vmem:[#allocation9 + $0x20] ss:$16 sps:$4 sm:$0xff]  }
  0x77   :  { %735 = vmatpush1.bf16.msra.mxu0 %v3187_v39  ;;  %776 = vmatpush1.bf16.msra.mxu1 %v3188_v40  ;;  %v133_v39 = vmul.f32 %v131_v14, %v3804_v59  ;;  %v3212_v40 = vld [vmem:[#allocation9 + $0x3a8] ss:$16 sps:$4 sm:$0xff]  }
  0x78   :  { %736 = vmatprep.subr.bf16.mxu0 %v3189_v41  ;;  %777 = vmatprep.subr.bf16.mxu1 %v3191_v43  ;;  %v3213_v41 = vld [vmem:[#allocation9 + $0x3c4] ss:$16 sps:$4 sm:$0xff]   ;;  %v285_v43 = vadd.f32 %v2761_v23, %v271_v31  ;;  %v297_v56 = vrot.slane %v286_v49, %v3792_v47  ;;  %v293_v57 = vrot.slane %v286_v49, %v3821_v28  ;;  %v3246_v49 = vld [vmem:[#allocation9 + $0x68] ss:$16 sps:$4 sm:$0xff]  }
  0x79   :  { %v2750_v60 = vrot.slane %v133_v39, 11  ;;  %v3233_v31 = vld [vmem:[#allocation9 + $0x24] ss:$16 sps:$4 sm:$0xff]  }
  0x7a   :  { %v287_v51 = vmax.f32 %v285_v43, 0.0  ;;  %v311_v3 = vpack.c.bf16 %v297_v56, %v297_v56  ;;  %v310_v4 = vpack.c.bf16 %v293_v57, %v293_v57  ;;  %v3237_v43 = vld [vmem:[#allocation9 + $0x40] ss:$16 sps:$4 sm:$0xff]   ;;  %v3260_v56 = vld [vmem:[#allocation9 + $0xac] ss:$16 sps:$4 sm:$0xff]  }
  0x7b   :  { %737 = vmatpush1.bf16.msra.mxu0 %v3193_v44  ;;  %778 = vmatpush1.bf16.msra.mxu1 %v3194_v45  ;;  %v114_v44 = vadd.f32 %v2743_v32, %v100_v29  ;;  %v115_v45 = vadd.f32 %v2744_v33, %v101_v30  ;;  %v3255_v57 = vld [vmem:[#allocation9 + $0xa0] ss:$16 sps:$4 sm:$0xff]  }
  0x7c   :  { %738 = vmatprep.subr.bf16.mxu0 %v3195_v46  ;;  %779 = vmatprep.subr.bf16.mxu1 %v3197_v48  ;;  %v2746_v46 = vrot.slane %v118_v34, 10  ;;  %v3215_v48 = vld [vmem:[#allocation9 + $0x3cc] ss:$16 sps:$4 sm:$0xff]   ;;  %v305_v63 = vrot.slane %v287_v51, %v3792_v47  ;;  %v384_v10 = vunpack.c.l.b16 %v311_v3  ;;  %v383_v14 = vunpack.c.l.b16 %v310_v4 }
  0x7d   :  { %v129_v58 = vadd.f32 %v2747_v50, %v115_v45  ;;  %v3236_v34 = vld [vmem:[#allocation9 + $0x2c] ss:$16 sps:$4 sm:$0xff]   ;;  %v3245_v45 = vld [vmem:[#allocation9 + $0x64] ss:$16 sps:$4 sm:$0xff]  }
  0x7e   :  { %v128_v52 = vadd.f32 %v2746_v46, %v114_v44  ;;  %v3240_v44 = vld [vmem:[#allocation9 + $0x48] ss:$16 sps:$4 sm:$0xff]   ;;  %v3248_v46 = vld [vmem:[#allocation9 + $0x6c] ss:$16 sps:$4 sm:$0xff]   ;;  %v3251_v50 = vld [vmem:[#allocation9 + $0x84] ss:$16 sps:$4 sm:$0xff]  }
  0x7f   :  { %739 = vmatpush1.bf16.msra.mxu0 %v3199_v53  ;;  %780 = vmatpush1.bf16.msra.mxu1 %v3200_v0  ;;  %v2749_v53 = vrot.slane %v132_v38, 11  ;;  %v301_v0 = vrot.slane %v287_v51, %v3821_v28  ;;  %v3833_v5 = vadd.f32 %v2750_v60, %v129_v58  ;;  %v3239_v38 = vld [vmem:[#allocation9 + $0x44] ss:$16 sps:$4 sm:$0xff]   ;;  %v3254_v51 = vld [vmem:[#allocation9 + $0x8c] ss:$16 sps:$4 sm:$0xff]  }
  0x80   :  { %740 = vmatprep.subr.bf16.mxu0 %v3201_v1  ;;  %781 = vmatprep.subr.bf16.mxu1 %v3203_v6  ;;  %v313_v6 = vpack.c.bf16 %v305_v63, %v305_v63  ;;  %v3258_v58 = vld [vmem:[#allocation9 + $0xa8] ss:$16 sps:$4 sm:$0xff]   ;;  %v3263_v60 = vld [vmem:[#allocation9 + $0xc4] ss:$16 sps:$4 sm:$0xff]   ;;  %v3266_v63 = vld [vmem:[#allocation9 + $0xcc] ss:$16 sps:$4 sm:$0xff]  }
  0x81   :  { %v3831_v1 = vadd.f32 %v2749_v53, %v128_v52  ;;  %v312_v7 = vpack.c.bf16 %v301_v0, %v301_v0  ;;  %v145_v11 = vmax.f32 %v3833_v5, 0.0  ;;  %v3249_v52 = vld [vmem:[#allocation9 + $0x80] ss:$16 sps:$4 sm:$0xff]   ;;  %v3252_v53 = vld [vmem:[#allocation9 + $0x88] ss:$16 sps:$4 sm:$0xff]  }
  0x82   :  { %v386_v13 = vunpack.c.l.b16 %v313_v6  ;;  %v3261_v0 = vld [vmem:[#allocation9 + $0xc0] ss:$16 sps:$4 sm:$0xff]   ;;  %v3269_v6 = vld [vmem:[#allocation9 + $0xe4] ss:$16 sps:$4 sm:$0xff]  }
  0x83   :  { %741 = vmatpush1.bf16.msra.mxu0 %v3205_v15  ;;  %782 = vmatpush1.bf16.msra.mxu1 %v3206_v20  ;;  %v144_v8 = vmax.f32 %v3831_v1, 0.0  ;;  %v385_v15 = vunpack.c.l.b16 %v312_v7  ;;  %v163_v19 = vrot.slane %v145_v11, %v3792_v47  ;;  %v1221_v7 = vstv %s3850_s2  ;;  %v3314_v1 = vld [vmem:[#allocation9 + $0x1cc] ss:$16 sps:$4 sm:$0xff]  }
  0x84   :  { %742 = vmatprep.subr.bf16.mxu0 %v3207_v21  ;;  %783 = vmatprep.subr.bf16.mxu1 %v3209_v26  ;;  %v390_v20 = vrot.slane %v386_v13, 7  ;;  %v3225_v26 = vld [vmem:[#allocation9] ss:$16 sps:$4 sm:$0xff]  }
  0x85   :  { %v155_v17 = vrot.slane %v144_v8, %v3792_v47  ;;  %v387_v21 = vrot.slane %v385_v15, 7  ;;  %v171_v23 = vpack.c.bf16 %v163_v19, %v163_v19  ;;  %v3270_v15 = vld [vmem:[#allocation9 + $0xe8] ss:$16 sps:$4 sm:$0xff]   ;;  %v3275_v19 = vld [vmem:[#allocation9 + $0x104] ss:$16 sps:$4 sm:$0xff]  }
  0x86   :  { %v391_v24 = vsel %vm388_vm0, %v390_v20, %v384_v10  ;;  %v3272_v10 = vld [vmem:[#allocation9 + $0xec] ss:$16 sps:$4 sm:$0xff]   ;;  %v1253_v20 = vstv %s3856_s18 }
  0x87   :  { %743 = vmatpush1.bf16.msra.mxu0 %v3211_v35  ;;  %784 = vmatpush1.bf16.msra.mxu1 %v3212_v40  ;;  %v169_v22 = vpack.c.bf16 %v155_v17, %v155_v17  ;;  %v389_v25 = vsel %vm388_vm0, %v387_v21, %v383_v14  ;;  %v393_v29 = vpack.c.b16 %v391_v24, %v391_v24  ;;  %v805_v33 = vunpack.c.l.b16 %v171_v23  ;;  %v3242_v40 = vld [vmem:[#allocation9 + $0x4c] ss:$16 sps:$4 sm:$0xff]   ;;  %v3267_v14 = vld [vmem:[#allocation9 + $0xe0] ss:$16 sps:$4 sm:$0xff]  }
  0x88   :  { %744 = vmatprep.subr.bf16.mxu0 %v3213_v41  ;;  %785 = vmatprep.subr.bf16.mxu1 %v3215_v48  ;;  %v392_v30 = vpack.c.b16 %v389_v25, %v389_v25  ;;  %v3243_v48 = vld [vmem:[#allocation9 + $0x60] ss:$16 sps:$4 sm:$0xff]   ;;  %v3278_v21 = vld [vmem:[#allocation9 + $0x10c] ss:$16 sps:$4 sm:$0xff]   ;;  %v3276_v25 = vld [vmem:[#allocation9 + $0x108] ss:$16 sps:$4 sm:$0xff]  }
  0x89   :  { %v803_v32 = vunpack.c.l.b16 %v169_v22  ;;  %748 = vmatprep.mubr.bf16.mxu0 %v393_v29  ;;  %789 = vmatprep.mubr.bf16.mxu1 %v393_v29  ;;  %v808_v35 = vrot.slane %v805_v33, 7  ;;  %v3273_v24 = vld [vmem:[#allocation9 + $0x100] ss:$16 sps:$4 sm:$0xff]  }
  0x8a   :  { %v3279_v33 = vld [vmem:[#allocation9 + $0x120] ss:$16 sps:$4 sm:$0xff]  }
  0x8b   :  { %745 = vmatpush1.bf16.msra.mxu0 %v3217_v55  ;;  %786 = vmatpush1.bf16.msra.mxu1 %v3218_v61  ;;  %v809_v39 = vsel %vm388_vm0, %v808_v35, %v803_v32  ;;  %v3257_v55 = vld [vmem:[#allocation9 + $0xa4] ss:$16 sps:$4 sm:$0xff]   ;;  %v1218_v61 = vstv %s3846_s0  ;;  %v3284_v32 = vld [vmem:[#allocation9 + $0x12c] ss:$16 sps:$4 sm:$0xff]   ;;  %v3282_v35 = vld [vmem:[#allocation9 + $0x128] ss:$16 sps:$4 sm:$0xff]  }
  0x8c   :  { %746 = vmatprep.subr.bf16.mxu0 %v3219_v62  ;;  %787 = vmatprep.subr.bf16.mxu1 %v3221_v2  ;;  %v811_v41 = vpack.c.b16 %v809_v39, %v809_v39  ;;  %v1225_v62 = vstv %s3848_s16  ;;  %v3264_v2 = vld [vmem:[#allocation9 + $0xc8] ss:$16 sps:$4 sm:$0xff]   ;;  %v1220_v3 = vmul.f32 %v1218_v61, %v3804_v59 }
  0x8d   :  { %v1227_v4 = vmul.f32 %v1225_v62, %v3804_v59  ;;  %v1226_v13 = vmul.f32 %v1225_v62, %v3798_v54 }
  0x8f   :  { %747 = vmatpush1.bf16.msra.mxu0 %v3223_v9  ;;  %788 = vmatpush1.bf16.msra.mxu1 %v3224_v12  ;;  %v1239_v9 = vstv %s3852_s17  ;;  %v1219_v12 = vmul.f32 %v1218_v61, %v3798_v54  ;;  %v2894_v17 = vrot.slane %v1227_v4, 9  ;;  %v2893_v23 = vrot.slane %v1226_v13, 9 }
  0x90   :  { %1134 = vmatprep.subr.bf16.mxu0 %v3227_v16  ;;  %1175 = vmatprep.subr.bf16.mxu1 %v3230_v18  ;;  %v1223_v16 = vadd.f32 %v1221_v7, %v1220_v3  ;;  %v1241_v18 = vmul.f32 %v1239_v9, %v3804_v59  ;;  %v3306_v3 = vld [vmem:[#allocation9 + $0x1a8] ss:$16 sps:$4 sm:$0xff]  }
  0x91   :  { %v1222_v22 = vadd.f32 %v1221_v7, %v1219_v12  ;;  %v3311_v7 = vld [vmem:[#allocation9 + $0x1c4] ss:$16 sps:$4 sm:$0xff]   ;;  %v3312_v12 = vld [vmem:[#allocation9 + $0x1c8] ss:$16 sps:$4 sm:$0xff]  }
  0x92   :  { %749 = vmatmul.mubr.bf16.vlgmr.msra.gmra.mrb[0].mxu0 %v392_v30  ;;  %790 = vmatmul.mubr.bf16.vlgmr.msra.gmra.mrb[0].mxu1 %v392_v30  ;;  %v2897_v29 = vrot.slane %v1241_v18, 10  ;;  %v1255_v30 = vmul.f32 %v1253_v20, %v3804_v59  ;;  %v3320_v18 = vld [vmem:[#allocation9 + $0x1ec] ss:$16 sps:$4 sm:$0xff]  }
  0x93   :  { %1135 = vmatpush1.bf16.msra.mxu0 %v3225_v26  ;;  %1176 = vmatpush1.bf16.msra.mxu1 %v3228_v27  ;;  %v1237_v26 = vadd.f32 %v2894_v17, %v1223_v16  ;;  %v1240_v27 = vmul.f32 %v1239_v9, %v3798_v54 }
  0x94   :  { %1136 = vmatprep.subr.bf16.mxu0 %v3233_v31  ;;  %1177 = vmatprep.subr.bf16.mxu1 %v3236_v34  ;;  %v3281_v31 = vld [vmem:[#allocation9 + $0x124] ss:$16 sps:$4 sm:$0xff]   ;;  %v1236_v34 = vadd.f32 %v2893_v23, %v1222_v22  ;;  %v2900_v39 = vrot.slane %v1255_v30, 11 }
  0x95   :  { %1166 = vmatprep.mubr.bf16.mxu0 %v811_v41  ;;  %1207 = vmatprep.mubr.bf16.mxu1 %v811_v41  ;;  %v3290_v41 = vld [vmem:[#allocation9 + $0x14c] ss:$16 sps:$4 sm:$0xff]  }
  0x97   :  { %1137 = vmatpush1.bf16.msra.mxu0 %v3231_v36  ;;  %1178 = vmatpush1.bf16.msra.mxu1 %v3234_v37  ;;  %v2896_v36 = vrot.slane %v1240_v27, 10  ;;  %v1251_v37 = vadd.f32 %v2897_v29, %v1237_v26  ;;  %v3321_v26 = vld [vmem:[#allocation9 + $0x400] ss:$16 sps:$4 sm:$0xff]   ;;  %v3324_v27 = vld [vmem:[#allocation9 + $0x408] ss:$16 sps:$4 sm:$0xff]  }
  0x98   :  { %1138 = vmatprep.subr.bf16.mxu0 %v3239_v38  ;;  %1179 = vmatprep.subr.bf16.mxu1 %v3242_v40  ;;  %v1254_v38 = vmul.f32 %v1253_v20, %v3798_v54  ;;  %v3287_v40 = vld [vmem:[#allocation9 + $0x144] ss:$16 sps:$4 sm:$0xff]   ;;  %v3291_v54 = vld [vmem:[#allocation9 + $0x160] ss:$16 sps:$4 sm:$0xff]   ;;  %v3318_v20 = vld [vmem:[#allocation9 + $0x1e8] ss:$16 sps:$4 sm:$0xff]  }
  0x9b   :  { %1139 = vmatpush1.bf16.msra.mxu0 %v3237_v43  ;;  %1180 = vmatpush1.bf16.msra.mxu1 %v3240_v44  ;;  %v3285_v43 = vld [vmem:[#allocation9 + $0x140] ss:$16 sps:$4 sm:$0xff]   ;;  %v3288_v44 = vld [vmem:[#allocation9 + $0x148] ss:$16 sps:$4 sm:$0xff]  }
  0x9c   :  { %1140 = vmatprep.subr.bf16.mxu0 %v3245_v45  ;;  %1181 = vmatprep.subr.bf16.mxu1 %v3248_v46  ;;  %v1250_v45 = vadd.f32 %v2896_v36, %v1236_v34  ;;  %v2899_v46 = vrot.slane %v1254_v38, 11  ;;  %v1783_v36 = vstv %s3887_s19  ;;  %v3335_v38 = vld [vmem:[#allocation9 + $0x444] ss:$16 sps:$4 sm:$0xff]  }
  0x9f   :  { %1141 = vmatpush1.bf16.msra.mxu0 %v3243_v48  ;;  %1182 = vmatpush1.bf16.msra.mxu1 %v3246_v49  ;;  %v3869_v48 = vadd.f32 %v2900_v39, %v1251_v37  ;;  %v3293_v49 = vld [vmem:[#allocation9 + $0x164] ss:$16 sps:$4 sm:$0xff]   ;;  %v1790_v37 = vstv %s3889_s20  ;;  %v3338_v39 = vld [vmem:[#allocation9 + $0x44c] ss:$16 sps:$4 sm:$0xff]  }
  0xa0   :  { %1142 = vmatprep.subr.bf16.mxu0 %v3251_v50  ;;  %1183 = vmatprep.subr.bf16.mxu1 %v3254_v51  ;;  %v3296_v50 = vld [vmem:[#allocation9 + $0x16c] ss:$16 sps:$4 sm:$0xff]   ;;  %v3294_v51 = vld [vmem:[#allocation9 + $0x168] ss:$16 sps:$4 sm:$0xff]  }
  0xa3   :  { %1143 = vmatpush1.bf16.msra.mxu0 %v3249_v52  ;;  %1184 = vmatpush1.bf16.msra.mxu1 %v3252_v53  ;;  %v3871_v52 = vadd.f32 %v2899_v46, %v1250_v45  ;;  %v1267_v53 = vmax.f32 %v3869_v48, 0.0  ;;  %v1786_v45 = vstv %s3893_s21  ;;  %v1804_v46 = vstv %s3895_s22 }
  0xa4   :  { %1144 = vmatprep.subr.bf16.mxu0 %v3257_v55  ;;  %1185 = vmatprep.subr.bf16.mxu1 %v3260_v56  ;;  %v3299_v55 = vld [vmem:[#allocation9 + $0x184] ss:$16 sps:$4 sm:$0xff]   ;;  %v159_v56 = vrot.slane %v145_v11, %v3821_v28  ;;  %v3308_v11 = vld [vmem:[#allocation9 + $0x1ac] ss:$16 sps:$4 sm:$0xff]  }
  0xa5   :  { %v1266_v61 = vmax.f32 %v3871_v52, 0.0  ;;  %v1285_v62 = vrot.slane %v1267_v53, %v3792_v47  ;;  %v3416_v52 = vld [vmem:[#allocation9 + $0x5ec] ss:$16 sps:$4 sm:$0xff]  }
  0xa6   :  { %v170_v5 = vpack.c.bf16 %v159_v56, %v159_v56  ;;  %v3339_v56 = vld [vmem:[#allocation9 + $0x460] ss:$16 sps:$4 sm:$0xff]  }
  0xa7   :  { %1145 = vmatpush1.bf16.msra.mxu0 %v3255_v57  ;;  %1186 = vmatpush1.bf16.msra.mxu1 %v3258_v58  ;;  %v3302_v57 = vld [vmem:[#allocation9 + $0x18c] ss:$16 sps:$4 sm:$0xff]   ;;  %v3297_v58 = vld [vmem:[#allocation9 + $0x180] ss:$16 sps:$4 sm:$0xff]   ;;  %v1277_v4 = vrot.slane %v1266_v61, %v3792_v47 }
  0xa8   :  { %1146 = vmatprep.subr.bf16.mxu0 %v3263_v60  ;;  %1187 = vmatprep.subr.bf16.mxu1 %v3266_v63  ;;  %v3300_v60 = vld [vmem:[#allocation9 + $0x188] ss:$16 sps:$4 sm:$0xff]   ;;  %v3305_v63 = vld [vmem:[#allocation9 + $0x1a4] ss:$16 sps:$4 sm:$0xff]  }
  0xa9   :  { %v1291_v13 = vpack.c.bf16 %v1277_v4, %v1277_v4  ;;  %v3356_v4 = vld [vmem:[#allocation9 + $0x4ac] ss:$16 sps:$4 sm:$0xff]  }
  0xab   :  { %1147 = vmatpush1.bf16.msra.mxu0 %v3261_v0  ;;  %1188 = vmatpush1.bf16.msra.mxu1 %v3264_v2  ;;  %v151_v0 = vrot.slane %v144_v8, %v3821_v28  ;;  %v3303_v2 = vld [vmem:[#allocation9 + $0x1a0] ss:$16 sps:$4 sm:$0xff]  }
  0xac   :  { %1148 = vmatprep.subr.bf16.mxu0 %v3269_v6  ;;  %1189 = vmatprep.subr.bf16.mxu1 %v3272_v10  ;;  %v1293_v6 = vpack.c.bf16 %v1285_v62, %v1285_v62  ;;  %v804_v10 = vunpack.c.l.b16 %v170_v5  ;;  %v3309_v8 = vld [vmem:[#allocation9 + $0x1c0] ss:$16 sps:$4 sm:$0xff]   ;;  %v3350_v62 = vld [vmem:[#allocation9 + $0x48c] ss:$16 sps:$4 sm:$0xff]  }
  0xad   :  { %v168_v9 = vpack.c.bf16 %v151_v0, %v151_v0 }
  0xae   :  { %v806_v17 = vrot.slane %v804_v10, 7  ;;  %v3354_v10 = vld [vmem:[#allocation9 + $0x4a8] ss:$16 sps:$4 sm:$0xff]  }
  0xaf   :  { %1149 = vmatpush1.bf16.msra.mxu0 %v3267_v14  ;;  %1190 = vmatpush1.bf16.msra.mxu1 %v3270_v15  ;;  %v1366_v14 = vunpack.c.l.b16 %v1293_v6  ;;  %v3317_v15 = vld [vmem:[#allocation9 + $0x1e4] ss:$16 sps:$4 sm:$0xff]   ;;  %v802_v16 = vunpack.c.l.b16 %v168_v9  ;;  %v3351_v9 = vld [vmem:[#allocation9 + $0x4a0] ss:$16 sps:$4 sm:$0xff]  }
  0xb0   :  { %1150 = vmatprep.subr.bf16.mxu0 %v3275_v19  ;;  %1191 = vmatprep.subr.bf16.mxu1 %v3278_v21  ;;  %v3315_v19 = vld [vmem:[#allocation9 + $0x1e0] ss:$16 sps:$4 sm:$0xff]   ;;  %v1364_v21 = vunpack.c.l.b16 %v1291_v13 }
  0xb1   :  { %v1369_v22 = vrot.slane %v1366_v14, 7  ;;  %v807_v23 = vsel %vm388_vm0, %v806_v17, %v802_v16  ;;  %v3360_v16 = vld [vmem:[#allocation9 + $0x4c8] ss:$16 sps:$4 sm:$0xff]   ;;  %v3365_v17 = vld [vmem:[#allocation9 + $0x4e4] ss:$16 sps:$4 sm:$0xff]  }
  0xb2   :  { %v810_v29 = vpack.c.b16 %v807_v23, %v807_v23  ;;  %v3363_v23 = vld [vmem:[#allocation9 + $0x4e0] ss:$16 sps:$4 sm:$0xff]  }
  0xb3   :  { %1151 = vmatpush1.bf16.msra.mxu0 %v3273_v24  ;;  %1192 = vmatpush1.bf16.msra.mxu1 %v3276_v25  ;;  %v3323_v24 = vld [vmem:[#allocation9 + $0x404] ss:$16 sps:$4 sm:$0xff]   ;;  %v3326_v25 = vld [vmem:[#allocation9 + $0x40c] ss:$16 sps:$4 sm:$0xff]   ;;  %v1370_v30 = vsel %vm388_vm0, %v1369_v22, %v1364_v21 }
  0xb4   :  { %1152 = vmatprep.subr.bf16.mxu0 %v3281_v31  ;;  %1193 = vmatprep.subr.bf16.mxu1 %v3284_v32  ;;  %v3329_v31 = vld [vmem:[#allocation9 + $0x424] ss:$16 sps:$4 sm:$0xff]   ;;  %v3332_v32 = vld [vmem:[#allocation9 + $0x42c] ss:$16 sps:$4 sm:$0xff]   ;;  %v1372_v34 = vpack.c.b16 %v1370_v30, %v1370_v30 }
  0xb7   :  { %1153 = vmatpush1.bf16.msra.mxu0 %v3279_v33  ;;  %1194 = vmatpush1.bf16.msra.mxu1 %v3282_v35  ;;  %v3327_v33 = vld [vmem:[#allocation9 + $0x420] ss:$16 sps:$4 sm:$0xff]   ;;  %v3330_v35 = vld [vmem:[#allocation9 + $0x428] ss:$16 sps:$4 sm:$0xff]  }
  0xb8   :  { %1154 = vmatprep.subr.bf16.mxu0 %v3287_v40  ;;  %1195 = vmatprep.subr.bf16.mxu1 %v3290_v41  ;;  %v1785_v40 = vmul.f32 %v1783_v36, %v3804_v59  ;;  %v1792_v41 = vmul.f32 %v1790_v37, %v3804_v59 }
  0xbb   :  { %1155 = vmatpush1.bf16.msra.mxu0 %v3285_v43  ;;  %1196 = vmatpush1.bf16.msra.mxu1 %v3288_v44  ;;  %v3333_v43 = vld [vmem:[#allocation9 + $0x440] ss:$16 sps:$4 sm:$0xff]   ;;  %v3336_v44 = vld [vmem:[#allocation9 + $0x448] ss:$16 sps:$4 sm:$0xff]  }
  0xbc   :  { %1156 = vmatprep.subr.bf16.mxu0 %v3293_v49  ;;  %1197 = vmatprep.subr.bf16.mxu1 %v3296_v50  ;;  %v3341_v49 = vld [vmem:[#allocation9 + $0x464] ss:$16 sps:$4 sm:$0xff]   ;;  %v3344_v50 = vld [vmem:[#allocation9 + $0x46c] ss:$16 sps:$4 sm:$0xff]  }
  0xbf   :  { %1157 = vmatpush1.bf16.msra.mxu0 %v3291_v54  ;;  %1198 = vmatpush1.bf16.msra.mxu1 %v3294_v51  ;;  %v1788_v54 = vadd.f32 %v1786_v45, %v1785_v40  ;;  %v2969_v51 = vrot.slane %v1792_v41, 9  ;;  %v3378_v40 = vld [vmem:[#allocation9 + $0x528] ss:$16 sps:$4 sm:$0xff]   ;;  %v3383_v41 = vld [vmem:[#allocation9 + $0x544] ss:$16 sps:$4 sm:$0xff]  }
  0xc0   :  { %1158 = vmatprep.subr.bf16.mxu0 %v3299_v55  ;;  %1199 = vmatprep.subr.bf16.mxu1 %v3302_v57  ;;  %v1806_v55 = vmul.f32 %v1804_v46, %v3804_v59  ;;  %v3342_v57 = vld [vmem:[#allocation9 + $0x468] ss:$16 sps:$4 sm:$0xff]  }
  0xc2   :  { %v2972_v0 = vrot.slane %v1806_v55, 10 }
  0xc3   :  { %1159 = vmatpush1.bf16.msra.mxu0 %v3297_v58  ;;  %1200 = vmatpush1.bf16.msra.mxu1 %v3300_v60  ;;  %v1818_v58 = vstv %s3899_s23  ;;  %v3347_v60 = vld [vmem:[#allocation9 + $0x484] ss:$16 sps:$4 sm:$0xff]  }
  0xc4   :  { %1160 = vmatprep.subr.bf16.mxu0 %v3305_v63  ;;  %1201 = vmatprep.subr.bf16.mxu1 %v3308_v11  ;;  %v1802_v63 = vadd.f32 %v2969_v51, %v1788_v54  ;;  %v1820_v5 = vmul.f32 %v1818_v58, %v3804_v59  ;;  %v3345_v11 = vld [vmem:[#allocation9 + $0x480] ss:$16 sps:$4 sm:$0xff]   ;;  %v3389_v54 = vld [vmem:[#allocation9 + $0x564] ss:$16 sps:$4 sm:$0xff]   ;;  %v3392_v51 = vld [vmem:[#allocation9 + $0x56c] ss:$16 sps:$4 sm:$0xff]  }
  0xc6   :  { %v1816_v6 = vadd.f32 %v2972_v0, %v1802_v63  ;;  %v3398_v63 = vld [vmem:[#allocation9 + $0x58c] ss:$16 sps:$4 sm:$0xff]   ;;  %v3393_v0 = vld [vmem:[#allocation9 + $0x580] ss:$16 sps:$4 sm:$0xff]  }
  0xc7   :  { %1161 = vmatpush1.bf16.msra.mxu0 %v3303_v2  ;;  %1202 = vmatpush1.bf16.msra.mxu1 %v3306_v3  ;;  %v3348_v2 = vld [vmem:[#allocation9 + $0x488] ss:$16 sps:$4 sm:$0xff]   ;;  %v3353_v3 = vld [vmem:[#allocation9 + $0x4a4] ss:$16 sps:$4 sm:$0xff]  }
  0xc8   :  { %1162 = vmatprep.subr.bf16.mxu0 %v3311_v7  ;;  %1203 = vmatprep.subr.bf16.mxu1 %v3314_v1  ;;  %v2975_v7 = vrot.slane %v1820_v5, 11  ;;  %v3359_v1 = vld [vmem:[#allocation9 + $0x4c4] ss:$16 sps:$4 sm:$0xff]   ;;  %v3396_v5 = vld [vmem:[#allocation9 + $0x588] ss:$16 sps:$4 sm:$0xff]  }
  0xca   :  { %v3908_v14 = vadd.f32 %v2975_v7, %v1816_v6  ;;  %v3402_v6 = vld [vmem:[#allocation9 + $0x5a8] ss:$16 sps:$4 sm:$0xff]   ;;  %v3407_v7 = vld [vmem:[#allocation9 + $0x5c4] ss:$16 sps:$4 sm:$0xff]  }
  0xcb   :  { %1163 = vmatpush1.bf16.msra.mxu0 %v3309_v8  ;;  %1204 = vmatpush1.bf16.msra.mxu1 %v3312_v12  ;;  %v3362_v8 = vld [vmem:[#allocation9 + $0x4cc] ss:$16 sps:$4 sm:$0xff]   ;;  %v3545_v12 = vld [vmem:[#allocation2] sm:$0xff] }
  0xcc   :  { %1164 = vmatprep.subr.bf16.mxu0 %v3317_v15  ;;  %1205 = vmatprep.subr.bf16.mxu1 %v3320_v18  ;;  %v1784_v59 = vmul.f32 %v3545_v12, %v1783_v36  ;;  %v1791_v13 = vmul.f32 %v3545_v12, %v1790_v37  ;;  %v3357_v15 = vld [vmem:[#allocation9 + $0x4c0] ss:$16 sps:$4 sm:$0xff]   ;;  %v3368_v18 = vld [vmem:[#allocation9 + $0x4ec] ss:$16 sps:$4 sm:$0xff]   ;;  %v1805_v21 = vmul.f32 %v3545_v12, %v1804_v46  ;;  %v1832_v22 = vmax.f32 %v3908_v14, 0.0 }
  0xcd   :  { %v3380_v36 = vld [vmem:[#allocation9 + $0x52c] ss:$16 sps:$4 sm:$0xff]   ;;  %v3495_v14 = vld [vmem:[#allocation9 + $0x7a0] ss:$16 sps:$4 sm:$0xff]  }
  0xce   :  { %v2971_v30 = vrot.slane %v1805_v21, 10 }
  0xcf   :  { %1165 = vmatpush1.bf16.msra.mxu0 %v3315_v19  ;;  %1206 = vmatpush1.bf16.msra.mxu1 %v3318_v20  ;;  %v1787_v19 = vadd.f32 %v1786_v45, %v1784_v59  ;;  %v2968_v20 = vrot.slane %v1791_v13, 9  ;;  %v3413_v59 = vld [vmem:[#allocation9 + $0x5e4] ss:$16 sps:$4 sm:$0xff]  }
  0xd0   :  { %1695 = vmatprep.subr.bf16.mxu0 %v3323_v24  ;;  %1736 = vmatprep.subr.bf16.mxu1 %v3326_v25  ;;  %v3366_v24 = vld [vmem:[#allocation9 + $0x4e8] ss:$16 sps:$4 sm:$0xff]   ;;  %v3371_v25 = vld [vmem:[#allocation9 + $0x504] ss:$16 sps:$4 sm:$0xff]  }
  0xd2   :  { %1167 = vmatmul.mubr.bf16.vlgmr.msra.gmra.mrb[4].mxu0 %v810_v29  ;;  %1208 = vmatmul.mubr.bf16.vlgmr.msra.gmra.mrb[4].mxu1 %v810_v29  ;;  %v1801_v29 = vadd.f32 %v2968_v20, %v1787_v19 }
  0xd3   :  { %1696 = vmatpush1.bf16.msra.mxu0 %v3321_v26  ;;  %1737 = vmatpush1.bf16.msra.mxu1 %v3324_v27  ;;  %v3374_v26 = vld [vmem:[#allocation9 + $0x50c] ss:$16 sps:$4 sm:$0xff]   ;;  %v1281_v27 = vrot.slane %v1267_v53, %v3821_v28  ;;  %v3375_v53 = vld [vmem:[#allocation9 + $0x520] ss:$16 sps:$4 sm:$0xff]  }
  0xd4   :  { %1697 = vmatprep.subr.bf16.mxu0 %v3329_v31  ;;  %1738 = vmatprep.subr.bf16.mxu1 %v3332_v32  ;;  %v1819_v31 = vmul.f32 %v3545_v12, %v1818_v58  ;;  %v1850_v32 = vrot.slane %v1832_v22, %v3792_v47  ;;  %v3408_v12 = vld [vmem:[#allocation9 + $0x5c8] ss:$16 sps:$4 sm:$0xff]  }
  0xd5   :  { %1727 = vmatprep.mubr.bf16.mxu0 %v1372_v34  ;;  %1768 = vmatprep.mubr.bf16.mxu1 %v1372_v34  ;;  %v3372_v34 = vld [vmem:[#allocation9 + $0x508] ss:$16 sps:$4 sm:$0xff]   ;;  %v1292_v37 = vpack.c.bf16 %v1281_v27, %v1281_v27 }
  0xd6   :  { %v1858_v48 = vpack.c.bf16 %v1850_v32, %v1850_v32  ;;  %v3434_v32 = vld [vmem:[#allocation9 + $0x64c] ss:$16 sps:$4 sm:$0xff]  }
  0xd7   :  { %1698 = vmatpush1.bf16.msra.mxu0 %v3327_v33  ;;  %1739 = vmatpush1.bf16.msra.mxu1 %v3330_v35  ;;  %v3369_v33 = vld [vmem:[#allocation9 + $0x500] ss:$16 sps:$4 sm:$0xff]   ;;  %v3377_v35 = vld [vmem:[#allocation9 + $0x524] ss:$16 sps:$4 sm:$0xff]  }
  0xd8   :  { %1699 = vmatprep.subr.bf16.mxu0 %v3335_v38  ;;  %1740 = vmatprep.subr.bf16.mxu1 %v3338_v39  ;;  %v1815_v38 = vadd.f32 %v2971_v30, %v1801_v29  ;;  %v2974_v39 = vrot.slane %v1819_v31, 11  ;;  %v1931_v46 = vunpack.c.l.b16 %v1858_v48  ;;  %v3423_v29 = vld [vmem:[#allocation9 + $0x620] ss:$16 sps:$4 sm:$0xff]   ;;  %v3426_v30 = vld [vmem:[#allocation9 + $0x628] ss:$16 sps:$4 sm:$0xff]  }
  0xd9   :  { %v3431_v31 = vld [vmem:[#allocation9 + $0x644] ss:$16 sps:$4 sm:$0xff]   ;;  %v3446_v48 = vld [vmem:[#allocation9 + $0x68c] ss:$16 sps:$4 sm:$0xff]  }
  0xda   :  { %v3917_v45 = vadd.f32 %v2974_v39, %v1815_v38  ;;  %v3438_v38 = vld [vmem:[#allocation9 + $0x668] ss:$16 sps:$4 sm:$0xff]   ;;  %v3443_v39 = vld [vmem:[#allocation9 + $0x684] ss:$16 sps:$4 sm:$0xff]  }
  0xdb   :  { %1700 = vmatpush1.bf16.msra.mxu0 %v3333_v43  ;;  %1741 = vmatpush1.bf16.msra.mxu1 %v3336_v44  ;;  %v3386_v43 = vld [vmem:[#allocation9 + $0x54c] ss:$16 sps:$4 sm:$0xff]   ;;  %v1365_v44 = vunpack.c.l.b16 %v1292_v37  ;;  %v3435_v37 = vld [vmem:[#allocation9 + $0x660] ss:$16 sps:$4 sm:$0xff]  }
  0xdc   :  { %1701 = vmatprep.subr.bf16.mxu0 %v3341_v49  ;;  %1742 = vmatprep.subr.bf16.mxu1 %v3344_v50  ;;  %v3381_v49 = vld [vmem:[#allocation9 + $0x540] ss:$16 sps:$4 sm:$0xff]   ;;  %v3384_v50 = vld [vmem:[#allocation9 + $0x548] ss:$16 sps:$4 sm:$0xff]   ;;  %v1831_v58 = vmax.f32 %v3917_v45, 0.0 }
  0xdd   :  { %v1367_v55 = vrot.slane %v1365_v44, 7  ;;  %v3447_v44 = vld [vmem:[#allocation9 + $0x6a0] ss:$16 sps:$4 sm:$0xff]   ;;  %v3504_v45 = vld [vmem:[#allocation9 + $0x7c8] ss:$16 sps:$4 sm:$0xff]  }
  0xdf   :  { %1702 = vmatpush1.bf16.msra.mxu0 %v3339_v56  ;;  %1743 = vmatpush1.bf16.msra.mxu1 %v3342_v57  ;;  %v3387_v56 = vld [vmem:[#allocation9 + $0x560] ss:$16 sps:$4 sm:$0xff]   ;;  %v3390_v57 = vld [vmem:[#allocation9 + $0x568] ss:$16 sps:$4 sm:$0xff]  }
  0xe0   :  { %1703 = vmatprep.subr.bf16.mxu0 %v3347_v60  ;;  %1744 = vmatprep.subr.bf16.mxu1 %v3350_v62  ;;  %v1934_v60 = vrot.slane %v1931_v46, 7  ;;  %v3395_v62 = vld [vmem:[#allocation9 + $0x584] ss:$16 sps:$4 sm:$0xff]   ;;  %v3450_v46 = vld [vmem:[#allocation9 + $0x6a8] ss:$16 sps:$4 sm:$0xff]  }
  0xe3   :  { %1704 = vmatpush1.bf16.msra.mxu0 %v3345_v11  ;;  %1745 = vmatpush1.bf16.msra.mxu1 %v3348_v2  ;;  %v3401_v11 = vld [vmem:[#allocation9 + $0x5a4] ss:$16 sps:$4 sm:$0xff]   ;;  %v3404_v2 = vld [vmem:[#allocation9 + $0x5ac] ss:$16 sps:$4 sm:$0xff]  }
  0xe4   :  { %1705 = vmatprep.subr.bf16.mxu0 %v3353_v3  ;;  %1746 = vmatprep.subr.bf16.mxu1 %v3356_v4  ;;  %v1273_v3 = vrot.slane %v1266_v61, %v3821_v28  ;;  %v3399_v4 = vld [vmem:[#allocation9 + $0x5a0] ss:$16 sps:$4 sm:$0xff]  }
  0xe7   :  { %1706 = vmatpush1.bf16.msra.mxu0 %v3351_v9  ;;  %1747 = vmatpush1.bf16.msra.mxu1 %v3354_v10  ;;  %v3410_v9 = vld [vmem:[#allocation9 + $0x5cc] ss:$16 sps:$4 sm:$0xff]   ;;  %v1842_v10 = vrot.slane %v1831_v58, %v3792_v47 }
  0xe8   :  { %1707 = vmatprep.subr.bf16.mxu0 %v3359_v1  ;;  %1748 = vmatprep.subr.bf16.mxu1 %v3362_v8  ;;  %v1290_v1 = vpack.c.bf16 %v1273_v3, %v1273_v3  ;;  %v3405_v8 = vld [vmem:[#allocation9 + $0x5c0] ss:$16 sps:$4 sm:$0xff]  }
  0xe9   :  { %v1856_v61 = vpack.c.bf16 %v1842_v10, %v1842_v10  ;;  %v3471_v3 = vld [vmem:[#allocation9 + $0x720] ss:$16 sps:$4 sm:$0xff]   ;;  %v3480_v10 = vld [vmem:[#allocation9 + $0x748] ss:$16 sps:$4 sm:$0xff]  }
  0xea   :  { %v1363_v13 = vunpack.c.l.b16 %v1290_v1  ;;  %v3485_v1 = vld [vmem:[#allocation9 + $0x764] ss:$16 sps:$4 sm:$0xff]  }
  0xeb   :  { %1708 = vmatpush1.bf16.msra.mxu0 %v3357_v15  ;;  %1749 = vmatpush1.bf16.msra.mxu1 %v3360_v16  ;;  %v3411_v15 = vld [vmem:[#allocation9 + $0x5e0] ss:$16 sps:$4 sm:$0xff]   ;;  %v3414_v16 = vld [vmem:[#allocation9 + $0x5e8] ss:$16 sps:$4 sm:$0xff]   ;;  %v1929_v47 = vunpack.c.l.b16 %v1856_v61  ;;  %v3491_v61 = vld [vmem:[#allocation9 + $0x784] ss:$16 sps:$4 sm:$0xff]  }
  0xec   :  { %1709 = vmatprep.subr.bf16.mxu0 %v3365_v17  ;;  %1750 = vmatprep.subr.bf16.mxu1 %v3368_v18  ;;  %v3419_v17 = vld [vmem:[#allocation9 + $0x604] ss:$16 sps:$4 sm:$0xff]   ;;  %v3422_v18 = vld [vmem:[#allocation9 + $0x60c] ss:$16 sps:$4 sm:$0xff]   ;;  %v1368_v19 = vsel %vm388_vm0, %v1367_v55, %v1363_v13 }
  0xed   :  { %v1371_v20 = vpack.c.b16 %v1368_v19, %v1368_v19  ;;  %v1935_v21 = vsel %vm388_vm0, %v1934_v60, %v1929_v47  ;;  %v3461_v55 = vld [vmem:[#allocation9 + $0x6e4] ss:$16 sps:$4 sm:$0xff]   ;;  %v3462_v60 = vld [vmem:[#allocation9 + $0x6e8] ss:$16 sps:$4 sm:$0xff]   ;;  %v3494_v13 = vld [vmem:[#allocation9 + $0x78c] ss:$16 sps:$4 sm:$0xff]  }
  0xee   :  { %v1937_v27 = vpack.c.b16 %v1935_v21, %v1935_v21  ;;  %v3497_v47 = vld [vmem:[#allocation9 + $0x7a4] ss:$16 sps:$4 sm:$0xff]   ;;  %v3500_v19 = vld [vmem:[#allocation9 + $0x7ac] ss:$16 sps:$4 sm:$0xff]  }
  0xef   :  { %1710 = vmatpush1.bf16.msra.mxu0 %v3363_v23  ;;  %1751 = vmatpush1.bf16.msra.mxu1 %v3366_v24  ;;  %v3417_v23 = vld [vmem:[#allocation9 + $0x600] ss:$16 sps:$4 sm:$0xff]   ;;  %v3420_v24 = vld [vmem:[#allocation9 + $0x608] ss:$16 sps:$4 sm:$0xff]  }
  0xf0   :  { %1711 = vmatprep.subr.bf16.mxu0 %v3371_v25  ;;  %1752 = vmatprep.subr.bf16.mxu1 %v3374_v26  ;;  %v3425_v25 = vld [vmem:[#allocation9 + $0x624] ss:$16 sps:$4 sm:$0xff]   ;;  %v3428_v26 = vld [vmem:[#allocation9 + $0x62c] ss:$16 sps:$4 sm:$0xff]  }
  0xf3   :  { %1712 = vmatpush1.bf16.msra.mxu0 %v3369_v33  ;;  %1753 = vmatpush1.bf16.msra.mxu1 %v3372_v34  ;;  %v3429_v33 = vld [vmem:[#allocation9 + $0x640] ss:$16 sps:$4 sm:$0xff]   ;;  %v3432_v34 = vld [vmem:[#allocation9 + $0x648] ss:$16 sps:$4 sm:$0xff]  }
  0xf4   :  { %1713 = vmatprep.subr.bf16.mxu0 %v3377_v35  ;;  %1754 = vmatprep.subr.bf16.mxu1 %v3380_v36  ;;  %v3437_v35 = vld [vmem:[#allocation9 + $0x664] ss:$16 sps:$4 sm:$0xff]   ;;  %v3440_v36 = vld [vmem:[#allocation9 + $0x66c] ss:$16 sps:$4 sm:$0xff]  }
  0xf7   :  { %1714 = vmatpush1.bf16.msra.mxu0 %v3375_v53  ;;  %1755 = vmatpush1.bf16.msra.mxu1 %v3378_v40  ;;  %v3441_v53 = vld [vmem:[#allocation9 + $0x680] ss:$16 sps:$4 sm:$0xff]   ;;  %v3444_v40 = vld [vmem:[#allocation9 + $0x688] ss:$16 sps:$4 sm:$0xff]  }
  0xf8   :  { %1715 = vmatprep.subr.bf16.mxu0 %v3383_v41  ;;  %1756 = vmatprep.subr.bf16.mxu1 %v3386_v43  ;;  %v3449_v41 = vld [vmem:[#allocation9 + $0x6a4] ss:$16 sps:$4 sm:$0xff]   ;;  %v3452_v43 = vld [vmem:[#allocation9 + $0x6ac] ss:$16 sps:$4 sm:$0xff]  }
  0xfb   :  { %1716 = vmatpush1.bf16.msra.mxu0 %v3381_v49  ;;  %1757 = vmatpush1.bf16.msra.mxu1 %v3384_v50  ;;  %v3455_v49 = vld [vmem:[#allocation9 + $0x6c4] ss:$16 sps:$4 sm:$0xff]   ;;  %v3458_v50 = vld [vmem:[#allocation9 + $0x6cc] ss:$16 sps:$4 sm:$0xff]  }
  0xfc   :  { %1717 = vmatprep.subr.bf16.mxu0 %v3389_v54  ;;  %1758 = vmatprep.subr.bf16.mxu1 %v3392_v51  ;;  %v3453_v54 = vld [vmem:[#allocation9 + $0x6c0] ss:$16 sps:$4 sm:$0xff]   ;;  %v3456_v51 = vld [vmem:[#allocation9 + $0x6c8] ss:$16 sps:$4 sm:$0xff]  }
  0xff   :  { %1718 = vmatpush1.bf16.msra.mxu0 %v3387_v56  ;;  %1759 = vmatpush1.bf16.msra.mxu1 %v3390_v57  ;;  %v3464_v56 = vld [vmem:[#allocation9 + $0x6ec] ss:$16 sps:$4 sm:$0xff]   ;;  %v3459_v57 = vld [vmem:[#allocation9 + $0x6e0] ss:$16 sps:$4 sm:$0xff]  }
 0x100   :  { %1719 = vmatprep.subr.bf16.mxu0 %v3395_v62  ;;  %1760 = vmatprep.subr.bf16.mxu1 %v3398_v63  ;;  %v3467_v62 = vld [vmem:[#allocation9 + $0x704] ss:$16 sps:$4 sm:$0xff]   ;;  %v3470_v63 = vld [vmem:[#allocation9 + $0x70c] ss:$16 sps:$4 sm:$0xff]  }
 0x103   :  { %1720 = vmatpush1.bf16.msra.mxu0 %v3393_v0  ;;  %1761 = vmatpush1.bf16.msra.mxu1 %v3396_v5  ;;  %v3465_v0 = vld [vmem:[#allocation9 + $0x700] ss:$16 sps:$4 sm:$0xff]   ;;  %v3468_v5 = vld [vmem:[#allocation9 + $0x708] ss:$16 sps:$4 sm:$0xff]  }
 0x104   :  { %1721 = vmatprep.subr.bf16.mxu0 %v3401_v11  ;;  %1762 = vmatprep.subr.bf16.mxu1 %v3404_v2  ;;  %v3473_v11 = vld [vmem:[#allocation9 + $0x724] ss:$16 sps:$4 sm:$0xff]   ;;  %v3476_v2 = vld [vmem:[#allocation9 + $0x72c] ss:$16 sps:$4 sm:$0xff]  }
 0x107   :  { %1722 = vmatpush1.bf16.msra.mxu0 %v3399_v4  ;;  %1763 = vmatpush1.bf16.msra.mxu1 %v3402_v6  ;;  %v3474_v4 = vld [vmem:[#allocation9 + $0x728] ss:$16 sps:$4 sm:$0xff]   ;;  %v3479_v6 = vld [vmem:[#allocation9 + $0x744] ss:$16 sps:$4 sm:$0xff]  }
 0x108   :  { %1723 = vmatprep.subr.bf16.mxu0 %v3407_v7  ;;  %1764 = vmatprep.subr.bf16.mxu1 %v3410_v9  ;;  %v3482_v7 = vld [vmem:[#allocation9 + $0x74c] ss:$16 sps:$4 sm:$0xff]   ;;  %v3477_v9 = vld [vmem:[#allocation9 + $0x740] ss:$16 sps:$4 sm:$0xff]  }
 0x10b   :  { %1724 = vmatpush1.bf16.msra.mxu0 %v3405_v8  ;;  %1765 = vmatpush1.bf16.msra.mxu1 %v3408_v12  ;;  %v3488_v8 = vld [vmem:[#allocation9 + $0x76c] ss:$16 sps:$4 sm:$0xff]   ;;  %v3483_v12 = vld [vmem:[#allocation9 + $0x760] ss:$16 sps:$4 sm:$0xff]  }
 0x10c   :  { %1725 = vmatprep.subr.bf16.mxu0 %v3413_v59  ;;  %1766 = vmatprep.subr.bf16.mxu1 %v3416_v52  ;;  %v3486_v59 = vld [vmem:[#allocation9 + $0x768] ss:$16 sps:$4 sm:$0xff]   ;;  %v1846_v52 = vrot.slane %v1832_v22, %v3821_v28 }
 0x10d   :  { %v3498_v22 = vld [vmem:[#allocation9 + $0x7a8] ss:$16 sps:$4 sm:$0xff]  }
 0x10f   :  { %1726 = vmatpush1.bf16.msra.mxu0 %v3411_v15  ;;  %1767 = vmatpush1.bf16.msra.mxu1 %v3414_v16  ;;  %v3489_v15 = vld [vmem:[#allocation9 + $0x780] ss:$16 sps:$4 sm:$0xff]   ;;  %v3492_v16 = vld [vmem:[#allocation9 + $0x788] ss:$16 sps:$4 sm:$0xff]  }
 0x110   :  { %2260 = vmatprep.subr.bf16.mxu0 %v3419_v17  ;;  %2301 = vmatprep.subr.bf16.mxu1 %v3422_v18  ;;  %v1838_v17 = vrot.slane %v1831_v58, %v3821_v28  ;;  %v1857_v18 = vpack.c.bf16 %v1846_v52, %v1846_v52 }
 0x112   :  { %1728 = vmatmul.mubr.bf16.vlgmr.msra.gmra.mrb[8].mxu0 %v1371_v20  ;;  %1769 = vmatmul.mubr.bf16.vlgmr.msra.gmra.mrb[8].mxu1 %v1371_v20  ;;  %v1855_v20 = vpack.c.bf16 %v1838_v17, %v1838_v17  ;;  %v1930_v21 = vunpack.c.l.b16 %v1857_v18 }
 0x113   :  { %2261 = vmatpush1.bf16.msra.mxu0 %v3417_v23  ;;  %2302 = vmatpush1.bf16.msra.mxu1 %v3420_v24  ;;  %v3503_v23 = vld [vmem:[#allocation9 + $0x7c4] ss:$16 sps:$4 sm:$0xff]   ;;  %v3506_v24 = vld [vmem:[#allocation9 + $0x7cc] ss:$16 sps:$4 sm:$0xff]  }
 0x114   :  { %2262 = vmatprep.subr.bf16.mxu0 %v3425_v25  ;;  %2303 = vmatprep.subr.bf16.mxu1 %v3428_v26  ;;  %v3501_v25 = vld [vmem:[#allocation9 + $0x7c0] ss:$16 sps:$4 sm:$0xff]   ;;  %v1928_v58 = vunpack.c.l.b16 %v1855_v20  ;;  %v1932_v26 = vrot.slane %v1930_v21, 7  ;;  %v3541_v20 = vld [vmem:[#allocation11 + $0x78] sm:$0xff]  }
 0x115   :  { %2292 = vmatprep.mubr.bf16.mxu0 %v1937_v27  ;;  %2333 = vmatprep.mubr.bf16.mxu1 %v1937_v27  ;;  %v3509_v27 = vld [vmem:[#allocation9 + $0x7e4] ss:$16 sps:$4 sm:$0xff]   ;;  %v3542_v21 = vld [vmem:[#allocation11 + $0xf8] sm:$0xff]  }
 0x117   :  { %2263 = vmatpush1.bf16.msra.mxu0 %v3423_v29  ;;  %2304 = vmatpush1.bf16.msra.mxu1 %v3426_v30  ;;  %v3512_v29 = vld [vmem:[#allocation9 + $0x7ec] ss:$16 sps:$4 sm:$0xff]   ;;  %v3507_v30 = vld [vmem:[#allocation9 + $0x7e0] ss:$16 sps:$4 sm:$0xff]  }
 0x118   :  { %2264 = vmatprep.subr.bf16.mxu0 %v3431_v31  ;;  %2305 = vmatprep.subr.bf16.mxu1 %v3434_v32  ;;  %v3510_v31 = vld [vmem:[#allocation9 + $0x7e8] ss:$16 sps:$4 sm:$0xff]   ;;  %v1933_v32 = vsel %vm388_vm0, %v1932_v26, %v1928_v58 }
 0x11b   :  { %2265 = vmatpush1.bf16.msra.mxu0 %v3429_v33  ;;  %2306 = vmatpush1.bf16.msra.mxu1 %v3432_v34  ;;  %v1936_v33 = vpack.c.b16 %v1933_v32, %v1933_v32 }
 0x11c   :  { %2266 = vmatprep.subr.bf16.mxu0 %v3437_v35  ;;  %2307 = vmatprep.subr.bf16.mxu1 %v3440_v36 }
 0x11f   :  { %2267 = vmatpush1.bf16.msra.mxu0 %v3435_v37  ;;  %2308 = vmatpush1.bf16.msra.mxu1 %v3438_v38 }
 0x120   :  { %2268 = vmatprep.subr.bf16.mxu0 %v3443_v39  ;;  %2309 = vmatprep.subr.bf16.mxu1 %v3446_v48 }
 0x123   :  { %2269 = vmatpush1.bf16.msra.mxu0 %v3441_v53  ;;  %2310 = vmatpush1.bf16.msra.mxu1 %v3444_v40  ;;  %v3513_v40 = vld [vmem:[#allocation11 + $0x40] sm:$0xff]  }
 0x124   :  { %2270 = vmatprep.subr.bf16.mxu0 %v3449_v41  ;;  %2311 = vmatprep.subr.bf16.mxu1 %v3452_v43  ;;  %v3514_v41 = vld [vmem:[#allocation11 + $0xc0] sm:$0xff]  }
 0x125   :  { %v3515_v43 = vld [vmem:[#allocation11] sm:$0xff]  }
 0x127   :  { %2271 = vmatpush1.bf16.msra.mxu0 %v3447_v44  ;;  %2312 = vmatpush1.bf16.msra.mxu1 %v3450_v46  ;;  %v3516_v44 = vld [vmem:[#allocation11 + $0x80] sm:$0xff]   ;;  %v3517_v46 = vld [vmem:[#allocation11 + $0x48] sm:$0xff]  }
 0x128   :  { %2272 = vmatprep.subr.bf16.mxu0 %v3455_v49  ;;  %2313 = vmatprep.subr.bf16.mxu1 %v3458_v50  ;;  %v3518_v49 = vld [vmem:[#allocation11 + $0xc8] sm:$0xff]  }
 0x129   :  { %v3519_v50 = vld [vmem:[#allocation11 + $0x8] sm:$0xff]  }
 0x12b   :  { %2273 = vmatpush1.bf16.msra.mxu0 %v3453_v54  ;;  %2314 = vmatpush1.bf16.msra.mxu1 %v3456_v51  ;;  %v3520_v54 = vld [vmem:[#allocation11 + $0x88] sm:$0xff]   ;;  %v3521_v51 = vld [vmem:[#allocation11 + $0x50] sm:$0xff]  }
 0x12c   :  { %2274 = vmatprep.subr.bf16.mxu0 %v3461_v55  ;;  %2315 = vmatprep.subr.bf16.mxu1 %v3464_v56  ;;  %v3522_v55 = vld [vmem:[#allocation11 + $0xd0] sm:$0xff]  }
 0x12d   :  { %v3523_v56 = vld [vmem:[#allocation11 + $0x10] sm:$0xff]  }
 0x12f   :  { %2275 = vmatpush1.bf16.msra.mxu0 %v3459_v57  ;;  %2316 = vmatpush1.bf16.msra.mxu1 %v3462_v60  ;;  %v3524_v57 = vld [vmem:[#allocation11 + $0x90] sm:$0xff]   ;;  %v3525_v60 = vld [vmem:[#allocation11 + $0x58] sm:$0xff]  }
 0x130   :  { %2276 = vmatprep.subr.bf16.mxu0 %v3467_v62  ;;  %2317 = vmatprep.subr.bf16.mxu1 %v3470_v63  ;;  %v3526_v62 = vld [vmem:[#allocation11 + $0xd8] sm:$0xff]  }
 0x131   :  { %v3527_v63 = vld [vmem:[#allocation11 + $0x18] sm:$0xff]  }
 0x133   :  { %2277 = vmatpush1.bf16.msra.mxu0 %v3465_v0  ;;  %2318 = vmatpush1.bf16.msra.mxu1 %v3468_v5  ;;  %v3528_v0 = vld [vmem:[#allocation11 + $0x98] sm:$0xff]   ;;  %v3529_v5 = vld [vmem:[#allocation11 + $0x60] sm:$0xff]  }
 0x134   :  { %2278 = vmatprep.subr.bf16.mxu0 %v3473_v11  ;;  %2319 = vmatprep.subr.bf16.mxu1 %v3476_v2  ;;  %v3530_v11 = vld [vmem:[#allocation11 + $0xe0] sm:$0xff]  }
 0x135   :  { %v3531_v2 = vld [vmem:[#allocation11 + $0x20] sm:$0xff]  }
 0x137   :  { %2279 = vmatpush1.bf16.msra.mxu0 %v3471_v3  ;;  %2320 = vmatpush1.bf16.msra.mxu1 %v3474_v4  ;;  %v3532_v3 = vld [vmem:[#allocation11 + $0xa0] sm:$0xff]   ;;  %v3533_v4 = vld [vmem:[#allocation11 + $0x68] sm:$0xff]  }
 0x138   :  { %2280 = vmatprep.subr.bf16.mxu0 %v3479_v6  ;;  %2321 = vmatprep.subr.bf16.mxu1 %v3482_v7  ;;  %v3534_v6 = vld [vmem:[#allocation11 + $0xe8] sm:$0xff]  }
 0x139   :  { %v3535_v7 = vld [vmem:[#allocation11 + $0x28] sm:$0xff]  }
 0x13b   :  { %2281 = vmatpush1.bf16.msra.mxu0 %v3477_v9  ;;  %2322 = vmatpush1.bf16.msra.mxu1 %v3480_v10  ;;  %v3536_v9 = vld [vmem:[#allocation11 + $0xa8] sm:$0xff]  }
 0x13c   :  { %2282 = vmatprep.subr.bf16.mxu0 %v3485_v1  ;;  %2323 = vmatprep.subr.bf16.mxu1 %v3488_v8 }
 0x13f   :  { %2283 = vmatpush1.bf16.msra.mxu0 %v3483_v12  ;;  %2324 = vmatpush1.bf16.msra.mxu1 %v3486_v59 }
 0x140   :  { %2284 = vmatprep.subr.bf16.mxu0 %v3491_v61  ;;  %2325 = vmatprep.subr.bf16.mxu1 %v3494_v13  ;;  %v3537_v61 = vld [vmem:[#allocation11 + $0x70] sm:$0xff]  }
 0x141   :  { %v3538_v13 = vld [vmem:[#allocation11 + $0xf0] sm:$0xff]  }
 0x143   :  { %2285 = vmatpush1.bf16.msra.mxu0 %v3489_v15  ;;  %2326 = vmatpush1.bf16.msra.mxu1 %v3492_v16 }
 0x144   :  { %2286 = vmatprep.subr.bf16.mxu0 %v3497_v47  ;;  %2327 = vmatprep.subr.bf16.mxu1 %v3500_v19  ;;  %v3539_v47 = vld [vmem:[#allocation11 + $0x30] sm:$0xff]  }
 0x145   :  { %v3540_v19 = vld [vmem:[#allocation11 + $0xb0] sm:$0xff]  }
 0x147   :  { %2287 = vmatpush1.bf16.msra.mxu0 %v3495_v14  ;;  %2328 = vmatpush1.bf16.msra.mxu1 %v3498_v22 }
 0x148   :  { %2288 = vmatprep.subr.bf16.mxu0 %v3503_v23  ;;  %2329 = vmatprep.subr.bf16.mxu1 %v3506_v24  ;;  %v3543_v23 = vld [vmem:[#allocation11 + $0x38] sm:$0xff]  }
 0x149   :  { %v3544_v24 = vld [vmem:[#allocation11 + $0xb8] sm:$0xff]  }
 0x14b   :  { %2289 = vmatpush1.bf16.msra.mxu0 %v3501_v25  ;;  %2330 = vmatpush1.bf16.msra.mxu1 %v3504_v45 }
 0x14c   :  { %2290 = vmatprep.subr.bf16.mxu0 %v3509_v27  ;;  %2331 = vmatprep.subr.bf16.mxu1 %v3512_v29 }
 0x14f   :  { %2291 = vmatpush1.bf16.msra.mxu0 %v3507_v30  ;;  %2332 = vmatpush1.bf16.msra.mxu1 %v3510_v31 }
 0x150   :  { %3073 = vmatprep.subr.bf16.mxu0 %v3513_v40  ;;  %3095 = vmatprep.subr.bf16.mxu1 %v3514_v41 }
 0x152   :  { %2293 = vmatmul.mubr.bf16.vlgmr.msra.gmra.mrb[12].mxu0 %v1936_v33  ;;  %2334 = vmatmul.mubr.bf16.vlgmr.msra.gmra.mrb[12].mxu1 %v1936_v33 }
 0x153   :  { %3074 = vmatpush3.bf16.msra.mxu0 %v3515_v43  ;;  %3096 = vmatpush3.bf16.msra.mxu1 %v3516_v44 }
 0x154   :  { %3075 = vmatprep.subr.bf16.mxu0 %v3517_v46  ;;  %3097 = vmatprep.subr.bf16.mxu1 %v3518_v49 }
 0x157   :  { %3076 = vmatpush3.bf16.msra.mxu0 %v3519_v50  ;;  %3098 = vmatpush3.bf16.msra.mxu1 %v3520_v54 }
 0x158   :  { %3077 = vmatprep.subr.bf16.mxu0 %v3521_v51  ;;  %3099 = vmatprep.subr.bf16.mxu1 %v3522_v55 }
 0x15b   :  { %3078 = vmatpush3.bf16.msra.mxu0 %v3523_v56  ;;  %3100 = vmatpush3.bf16.msra.mxu1 %v3524_v57 }
 0x15c   :  { %3079 = vmatprep.subr.bf16.mxu0 %v3525_v60  ;;  %3101 = vmatprep.subr.bf16.mxu1 %v3526_v62 }
 0x15f   :  { %3080 = vmatpush3.bf16.msra.mxu0 %v3527_v63  ;;  %3102 = vmatpush3.bf16.msra.mxu1 %v3528_v0 }
 0x160   :  { %3081 = vmatprep.subr.bf16.mxu0 %v3529_v5  ;;  %3103 = vmatprep.subr.bf16.mxu1 %v3530_v11 }
 0x163   :  { %3082 = vmatpush3.bf16.msra.mxu0 %v3531_v2  ;;  %3104 = vmatpush3.bf16.msra.mxu1 %v3532_v3 }
 0x164   :  { %3083 = vmatprep.subr.bf16.mxu0 %v3533_v4  ;;  %3105 = vmatprep.subr.bf16.mxu1 %v3534_v6 }
 0x165   :  { %v750_v34 = vpop.f32.mrb[0].mxu0  ;;  %v791_v35 = vpop.f32.mrb[0].mxu1 }
 0x166   :  { %v752_v36 = vpop.f32.mrb[1].mxu0  ;;  %v793_v37 = vpop.f32.mrb[1].mxu1 }
 0x167   :  { %v754_v38 = vpop.f32.mrb[2].mxu0  ;;  %v795_v39 = vpop.f32.mrb[2].mxu1  ;;  %3084 = vmatpush3.bf16.msra.mxu0 %v3535_v7  ;;  %3106 = vmatpush3.bf16.msra.mxu1 %v3536_v9 }
 0x168   :  { %v755_v48 = vpop.f32.mrb[3].mxu0  ;;  %v796_v53 = vpop.f32.mrb[3].mxu1  ;;  %3085 = vmatprep.subr.bf16.mxu0 %v3537_v61  ;;  %3107 = vmatprep.subr.bf16.mxu1 %v3538_v13  ;;  %v2354_v38 = vsub.s32 1, %v3787_v42  ;;  %v2362_v39 = vsub.s32 3, %v3787_v42 }
 0x16b   :  { %3086 = vmatpush3.bf16.msra.mxu0 %v3539_v47  ;;  %3108 = vmatpush3.bf16.msra.mxu1 %v3540_v19 }
 0x16c   :  { %3087 = vmatprep.subr.bf16.mxu0 %v3541_v20  ;;  %3109 = vmatprep.subr.bf16.mxu1 %v3542_v21 }
 0x16f   :  { %3088 = vmatpush3.bf16.msra.mxu0 %v3543_v23  ;;  %3110 = vmatpush3.bf16.msra.mxu1 %v3544_v24 }
 0x1a5   :  { %v1168_v10 = vpop.f32.mrb[4].mxu0  ;;  %v1209_v1 = vpop.f32.mrb[4].mxu1 }
 0x1a6   :  { %v1169_v8 = vadd.f32 %v1168_v10, %v750_v34  ;;  %v1210_v12 = vadd.f32 %v1209_v1, %v791_v35  ;;  %v1170_v59 = vpop.f32.mrb[5].mxu0  ;;  %v1211_v52 = vpop.f32.mrb[5].mxu1 }
 0x1a7   :  { %v1171_v15 = vadd.f32 %v1170_v59, %v752_v36  ;;  %v1212_v16 = vadd.f32 %v1211_v52, %v793_v37  ;;  %v1172_v17 = vpop.f32.mrb[6].mxu0  ;;  %v1213_v18 = vpop.f32.mrb[6].mxu1  ;;  %v2358_v36 = vsub.s32 2, %v3787_v42  ;;  %v2346_v37 = vld [vmem:[%s3961_s4] sm:$0xf] }
 0x1a8   :  { %v1173_v14 = vpop.f32.mrb[7].mxu0  ;;  %v1214_v22 = vpop.f32.mrb[7].mxu1  ;;  %v2351_v48 = vrot.slane %v2346_v37, %v3821_v28  ;;  %v2355_v43 = vrot.slane %v2346_v37, %v2354_v38  ;;  %v2363_v44 = vrot.slane %v2346_v37, %v2362_v39 }
 0x1a9   :  { %v2359_v53 = vrot.slane %v2346_v37, %v2358_v36 }
 0x1e5   :  { %v1729_v25 = vpop.f32.mrb[8].mxu0  ;;  %v1770_v45 = vpop.f32.mrb[8].mxu1 }
 0x1e6   :  { %v1777_v58 = vadd.f32 %v1729_v25, %v1169_v8  ;;  %v1779_v26 = vadd.f32 %v1770_v45, %v1210_v12  ;;  %v1731_v27 = vpop.f32.mrb[9].mxu0  ;;  %v1772_v29 = vpop.f32.mrb[9].mxu1  ;;  %v3040_v8 = vld [vmem:[%s3963_s6] ss:$0 sm:$0xff] }
 0x1e7   :  { %v1778_v30 = vadd.f32 %v1731_v27, %v1171_v15  ;;  %v1780_v31 = vadd.f32 %v1772_v29, %v1212_v16  ;;  %v1733_v32 = vpop.f32.mrb[10].mxu0  ;;  %v1774_v33 = vpop.f32.mrb[10].mxu1 }
 0x1e8   :  { %v1734_v34 = vpop.f32.mrb[11].mxu0  ;;  %v1775_v35 = vpop.f32.mrb[11].mxu1 }
 0x225   :  { %v2294_v40 = vpop.f32.mrb[12].mxu0  ;;  %v2335_v41 = vpop.f32.mrb[12].mxu1 }
 0x226   :  { %v2342_v46 = vadd.f32 %v2294_v40, %v1777_v58  ;;  %v2344_v49 = vadd.f32 %v2335_v41, %v1779_v26  ;;  %v2296_v50 = vpop.f32.mrb[13].mxu0  ;;  %v2337_v54 = vpop.f32.mrb[13].mxu1 }
 0x227   :  { %v2343_v51 = vadd.f32 %v2296_v50, %v1778_v30  ;;  %v2345_v55 = vadd.f32 %v2337_v54, %v1780_v31  ;;  %v2298_v56 = vpop.f32.mrb[14].mxu0  ;;  %v2339_v57 = vpop.f32.mrb[14].mxu1 }
 0x228   :  { %v2368_v60 = vadd.f32 %v2351_v48, %v2342_v46  ;;  %v2370_v62 = vadd.f32 %v2359_v53, %v2344_v49  ;;  %v2299_v63 = vpop.f32.mrb[15].mxu0  ;;  %v2340_v0 = vpop.f32.mrb[15].mxu1 }
 0x229   :  { %v2369_v42 = vadd.f32 %v2355_v43, %v2343_v51  ;;  %v2371_v5 = vadd.f32 %v2363_v44, %v2345_v55 }
 0x22a   :  { %v2372_v28 = vmax.f32 %v2368_v60, 0.0  ;;  %v2374_v11 = vmax.f32 %v2370_v62, 0.0 }
 0x22b   :  { %v2373_v2 = vmax.f32 %v2369_v42, 0.0  ;;  %v2375_v3 = vmax.f32 %v2371_v5, 0.0 }
 0x22c   :  { %v2376_v7 = vpack.c.bf16 %v2372_v28, %v2372_v28  ;;  %v2378_v9 = vpack.c.bf16 %v2374_v11, %v2374_v11 }
 0x22d   :  { %v2377_v4 = vpack.c.bf16 %v2373_v2, %v2373_v2  ;;  %v2379_v6 = vpack.c.bf16 %v2375_v3, %v2375_v3 }
 0x22f   :  { %2675 = vmatprep.mubr.bf16.mxu0 %v2377_v4  ;;  %2715 = vmatprep.mubr.bf16.mxu1 %v2379_v6 }
 0x230   :  { %2676 = vmatmul.mubr.bf16.vlgmr.msra.gmra.mrb[16].mxu0 %v2376_v7  ;;  %2716 = vmatmul.mubr.bf16.vlgmr.msra.gmra.mrb[16].mxu1 %v2378_v9 }
 0x303   :  { %v3089_v10 = vpop.f32.mrb[16].mxu0  ;;  %v3111_v1 = vpop.f32.mrb[16].mxu1 }
 0x304   :  { %v3090_v12 = vpop.f32.mrb[17].mxu0  ;;  %v3112_v59 = vpop.f32.mrb[17].mxu1 }
 0x305   :  { %v3091_v52 = vadd.f32 %v3090_v12, %v3089_v10  ;;  %v3113_v61 = vadd.f32 %v3112_v59, %v3111_v1  ;;  %v3092_v13 = vpop.f32.mrb[18].mxu0  ;;  %v3114_v15 = vpop.f32.mrb[18].mxu1 }
 0x306   :  { %v3093_v16 = vpop.f32.mrb[19].mxu0  ;;  %v3115_v17 = vpop.f32.mrb[19].mxu1 }
 0x307   :  { %v2678_v18 = vadd.f32 %v3091_v52, %v3040_v8 }
 0x309   :  { %v2718_v47 = vadd.f32 %v3113_v61, %v2678_v18 }
 0x30b   :  { %2723 = vst [vmem:[#allocation12] sm:$0x3] %v2718_v47 }
 0x30c   :  { %3645 = shalt.err (!%p3642_p8)
}
 0x30d   :  { %s3646_s29 = scalar_lea.hbm %s3964_s7, 32 }
 0x30e   :  { %p3647_p9 = scmp.ne.s32.totalorder %s3964_s7, %s3646_s29  ;;  %p3650_p10 = scmp.lt.u32.totalorder %s3646_s29, %s3964_s7 }
 0x310   :  { %p3652_p11 = pnand %p3650_p10, %p3647_p9 }
 0x312   :  { %3655 = shalt.err (!%p3652_p11)
}
 0x313   :  { %2733 = dma.vmem_to_hbm [thread:$0]  %s2731_s26, 32, %s3964_s7, [#allocation4]  }
 0x314   :  { %3664 = dma.done.wait [#allocation4], 32  }
 0x315   :  { %3665 = vsyncadd [#allocation4], 4294967264 }
 0x316   :  { %2737 = vsyncpa [#allocation3], 1 }
 0x317   :  { %2738 = vsyncpa [#allocation10], 1 }
 0x318   :  { %2739 = vsyncpa [#allocation4], 1 }
 0x319   :  { %2740 = vsyncpa [#allocation5], 1 }
 0x31a   :  { %2741 = vsyncpa [#allocation6], 1 }

</bundles_post_ra>
